<compile_context>
chip_gen: v7x
topology: tpu7x:2x2x1
jax: 0.10.0
libtpu: 0.0.40
codegen_flags: <defaults>
</compile_context>

<pallas_src>
import jax
import jax.numpy as jnp
from jax.experimental import pallas as pl
from jax.experimental.pallas import tpu as pltpu

IN_DIM = 1000    # logical encoder in / decoder out features
HID_DIM = 300    # logical hidden features
IN_PAD = 1024    # lane-padded (multiple of 128)
HID_PAD = 384    # lane-padded (multiple of 128)


def net_kernel(x_ref, w_enc_ref, b_enc_ref, w_dec_ref, b_dec_ref, out_ref):
    """Fused encoder->decoder forward for one batch tile.

    x_ref:     (TB, 1024)    bf16
    w_enc_ref: (1024, 384)   bf16   (encoder.weight.T, zero-padded)
    b_enc_ref: (1, 384)      f32    (zero-padded)
    w_dec_ref: (384, 1024)   bf16   (decoder.weight.T, zero-padded)
    b_dec_ref: (1, 1024)     f32    (zero-padded)
    out_ref:   (TB, 1024)    f32
    """
    x = x_ref[...]
    # encode = x @ W_enc^T + b_enc   (bf16 MXU inputs, f32 accumulation)
    encode = jnp.dot(x, w_enc_ref[...], preferred_element_type=jnp.float32)
    encode = encode + b_enc_ref[...]
    # decode = encode @ W_dec^T + b_dec
    encode_b = encode.astype(jnp.bfloat16)
    decode = jnp.dot(encode_b, w_dec_ref[...], preferred_element_type=jnp.float32)
    decode = decode + b_dec_ref[...]
    out_ref[...] = decode.astype(out_ref.dtype)


def net_forward(x, w_enc_t, b_enc, w_dec_t, b_dec, *, tb=256):
    """x: (B, 1000) f32. Returns (B, 1000) f32."""
    B = x.shape[0]
    # Batch tile: multiple of 16 (bf16 sublane packing); cap at `tb`.
    TB = min(tb, max(16, ((B + 15) // 16) * 16))
    n_tiles = pl.cdiv(B, TB)
    B_pad = n_tiles * TB

    # Zero-pad batch + feature lanes; cast activations to bf16 (halves DMA bytes).
    x_p = jnp.zeros((B_pad, IN_PAD), jnp.bfloat16)
    x_p = x_p.at[:B, :IN_DIM].set(x.astype(jnp.bfloat16))

    flops = 2 * B_pad * (IN_PAD * HID_PAD + HID_PAD * IN_PAD)
    bytes_accessed = (
        B_pad * IN_PAD * 2                       # x in (bf16)
        + IN_PAD * HID_PAD * 2                   # w_enc (bf16)
        + HID_PAD * 4                            # b_enc (f32)
        + HID_PAD * IN_PAD * 2                   # w_dec (bf16)
        + IN_PAD * 4                             # b_dec (f32)
        + B_pad * IN_PAD * 4                     # out (f32)
    )

    out = pl.pallas_call(
        net_kernel,
        out_shape=jax.ShapeDtypeStruct((B_pad, IN_PAD), jnp.float32),
        grid=(n_tiles,),
        in_specs=[
            pl.BlockSpec((TB, IN_PAD), lambda i: (i, 0)),        # x: batch-tiled
            pl.BlockSpec((IN_PAD, HID_PAD), lambda i: (0, 0)),   # w_enc: resident
            pl.BlockSpec((1, HID_PAD), lambda i: (0, 0)),        # b_enc: resident
            pl.BlockSpec((HID_PAD, IN_PAD), lambda i: (0, 0)),   # w_dec: resident
            pl.BlockSpec((1, IN_PAD), lambda i: (0, 0)),         # b_dec: resident
        ],
        out_specs=pl.BlockSpec((TB, IN_PAD), lambda i: (i, 0)),
        compiler_params=pltpu.CompilerParams(
            dimension_semantics=("parallel",),
        ),
        cost_estimate=pl.CostEstimate(
            flops=flops, transcendentals=0, bytes_accessed=bytes_accessed),
    )(x_p, w_enc_t, b_enc, w_dec_t, b_dec)

    # Slice padded batch rows / feature lanes back off.
    return out[:B, :IN_DIM]


def init_params(key):
    """Deterministic init mimicking torch.nn.Linear defaults
    (U(-1/sqrt(fan_in), 1/sqrt(fan_in)) for weight and bias), stored
    transposed, lane-padded with exact zeros, weights in bf16."""
    k1, k2, k3, k4 = jax.random.split(key, 4)
    bound_enc = IN_DIM ** -0.5
    bound_dec = HID_DIM ** -0.5

    w_enc = jax.random.uniform(k1, (IN_DIM, HID_DIM), jnp.float32,
                               -bound_enc, bound_enc)
    b_enc = jax.random.uniform(k2, (HID_DIM,), jnp.float32,
                               -bound_enc, bound_enc)
    w_dec = jax.random.uniform(k3, (HID_DIM, IN_DIM), jnp.float32,
                               -bound_dec, bound_dec)
    b_dec = jax.random.uniform(k4, (IN_DIM,), jnp.float32,
                               -bound_dec, bound_dec)

    w_enc_p = jnp.zeros((IN_PAD, HID_PAD), jnp.bfloat16)
    w_enc_p = w_enc_p.at[:IN_DIM, :HID_DIM].set(w_enc.astype(jnp.bfloat16))
    b_enc_p = jnp.zeros((1, HID_PAD), jnp.float32).at[0, :HID_DIM].set(b_enc)

    w_dec_p = jnp.zeros((HID_PAD, IN_PAD), jnp.bfloat16)
    w_dec_p = w_dec_p.at[:HID_DIM, :IN_DIM].set(w_dec.astype(jnp.bfloat16))
    b_dec_p = jnp.zeros((1, IN_PAD), jnp.float32).at[0, :IN_DIM].set(b_dec)

    return w_enc_p, b_enc_p, w_dec_p, b_dec_p


if __name__ == "__main__":
    key = jax.random.PRNGKey(0)
    key_x, key_p = jax.random.split(key)

    B = 8  # small batch
    x = jax.random.normal(key_x, (B, IN_DIM), jnp.float32)
    w_enc_p, b_enc_p, w_dec_p, b_dec_p = init_params(key_p)

    out = net_forward(x, w_enc_p, b_enc_p, w_dec_p, b_dec_p)
    out = jax.block_until_ready(out)
    assert out.shape == (B, IN_DIM)

    # Reference in plain JAX, mirroring the kernel's bf16 quantization points.
    x_b = x.astype(jnp.bfloat16).astype(jnp.float32)
    w_enc_f = w_enc_p[:IN_DIM, :HID_DIM].astype(jnp.float32)
    w_dec_f = w_dec_p[:HID_DIM, :IN_DIM].astype(jnp.float32)
    enc_ref = x_b @ w_enc_f + b_enc_p[0, :HID_DIM]
    enc_ref = enc_ref.astype(jnp.bfloat16).astype(jnp.float32)
    ref = enc_ref @ w_dec_f + b_dec_p[0, :IN_DIM]

    assert jnp.allclose(out, ref, atol=5e-3, rtol=5e-3), (
        float(jnp.max(jnp.abs(out - ref))))

    print("KERNEL_OK")
</pallas_src>

<mosaic_0001>
module attributes {stable_mosaic.version = 11 : i64} {
  func.func @net_kernel(%arg0: i32, %arg1: memref<16x1024xbf16, #tpu.memory_space<vmem>>, %arg2: memref<1024x384xbf16, #tpu.memory_space<vmem>>, %arg3: memref<1x384xf32, #tpu.memory_space<vmem>>, %arg4: memref<384x1024xbf16, #tpu.memory_space<vmem>>, %arg5: memref<1x1024xf32, #tpu.memory_space<vmem>>, %arg6: memref<16x1024xf32, #tpu.memory_space<vmem>>) attributes {dimension_semantics = [#tpu.dimension_semantics<parallel>], iteration_bounds = array<i64: 1>, scalar_prefetch = 0 : i64, scratch_operands = 0 : i64, tpu.core_type = #tpu.core_type<tc>, window_params = [{transform_indices = @transform_0, window_bounds = array<i64: 16, 1024>}, {pipeline_mode = #tpu.pipeline_mode<synchronous>, transform_indices = @transform_1, window_bounds = array<i64: 1024, 384>}, {pipeline_mode = #tpu.pipeline_mode<synchronous>, transform_indices = @transform_2, window_bounds = array<i64: 1, 384>}, {pipeline_mode = #tpu.pipeline_mode<synchronous>, transform_indices = @transform_3, window_bounds = array<i64: 384, 1024>}, {pipeline_mode = #tpu.pipeline_mode<synchronous>, transform_indices = @transform_4, window_bounds = array<i64: 1, 1024>}, {transform_indices = @transform_5, window_bounds = array<i64: 16, 1024>}]} {
    %c0 = arith.constant 0 : index
    %c0_0 = arith.constant 0 : index
    %0 = vector.load %arg1[%c0, %c0_0] : memref<16x1024xbf16, #tpu.memory_space<vmem>>, vector<16x1024xbf16>
    %c0_1 = arith.constant 0 : index
    %c0_2 = arith.constant 0 : index
    %1 = vector.load %arg2[%c0_1, %c0_2] : memref<1024x384xbf16, #tpu.memory_space<vmem>>, vector<1024x384xbf16>
    %cst = arith.constant dense<0.000000e+00> : vector<16x384xf32>
    %2 = tpu.matmul %0, %1, %cst {dimension_numbers = #tpu.dot_dimension_numbers<[1], [0], [0], [1], [0, 0, 1, 1], [], []>} : vector<16x1024xbf16>, vector<1024x384xbf16>, vector<16x384xf32> -> vector<16x384xf32>
    %c0_3 = arith.constant 0 : index
    %c0_4 = arith.constant 0 : index
    %3 = vector.load %arg3[%c0_3, %c0_4] : memref<1x384xf32, #tpu.memory_space<vmem>>, vector<1x384xf32>
    %4 = vector.broadcast %3 : vector<1x384xf32> to vector<16x384xf32>
    %5 = arith.addf %2, %4 : vector<16x384xf32>
    %6 = arith.truncf %5 : vector<16x384xf32> to vector<16x384xbf16>
    %c0_5 = arith.constant 0 : index
    %c0_6 = arith.constant 0 : index
    %7 = vector.load %arg4[%c0_5, %c0_6] : memref<384x1024xbf16, #tpu.memory_space<vmem>>, vector<384x1024xbf16>
    %cst_7 = arith.constant dense<0.000000e+00> : vector<16x1024xf32>
    %8 = tpu.matmul %6, %7, %cst_7 {dimension_numbers = #tpu.dot_dimension_numbers<[1], [0], [0], [1], [0, 0, 1, 1], [], []>} : vector<16x384xbf16>, vector<384x1024xbf16>, vector<16x1024xf32> -> vector<16x1024xf32>
    %c0_8 = arith.constant 0 : index
    %c0_9 = arith.constant 0 : index
    %9 = vector.load %arg5[%c0_8, %c0_9] : memref<1x1024xf32, #tpu.memory_space<vmem>>, vector<1x1024xf32>
    %10 = vector.broadcast %9 : vector<1x1024xf32> to vector<16x1024xf32>
    %11 = arith.addf %8, %10 : vector<16x1024xf32>
    %c0_10 = arith.constant 0 : index
    %c0_11 = arith.constant 0 : index
    %12 = vector.load %arg6[%c0_10, %c0_11] : memref<16x1024xf32, #tpu.memory_space<vmem>>, vector<16x1024xf32>
    tpu.vector_store %arg6[%c0_10, %c0_11], %11 {strides = array<i32>} : memref<16x1024xf32, #tpu.memory_space<vmem>>, vector<16x1024xf32>,
    return
  }
  func.func @transform_0(%arg0: i32) -> (i32, i32) {
    %c0_i32 = arith.constant 0 : i32
    %c0_i32_0 = arith.constant 0 : i32
    return %arg0, %c0_i32 : i32, i32
  }
  func.func @transform_1(%arg0: i32) -> (i32, i32) {
    %c0_i32 = arith.constant 0 : i32
    %c0_i32_0 = arith.constant 0 : i32
    %c0_i32_1 = arith.constant 0 : i32
    return %c0_i32, %c0_i32_0 : i32, i32
  }
  func.func @transform_2(%arg0: i32) -> (i32, i32) {
    %c0_i32 = arith.constant 0 : i32
    %c0_i32_0 = arith.constant 0 : i32
    %c0_i32_1 = arith.constant 0 : i32
    return %c0_i32, %c0_i32_0 : i32, i32
  }
  func.func @transform_3(%arg0: i32) -> (i32, i32) {
    %c0_i32 = arith.constant 0 : i32
    %c0_i32_0 = arith.constant 0 : i32
    %c0_i32_1 = arith.constant 0 : i32
    return %c0_i32, %c0_i32_0 : i32, i32
  }
  func.func @transform_4(%arg0: i32) -> (i32, i32) {
    %c0_i32 = arith.constant 0 : i32
    %c0_i32_0 = arith.constant 0 : i32
    %c0_i32_1 = arith.constant 0 : i32
    return %c0_i32, %c0_i32_0 : i32, i32
  }
  func.func @transform_5(%arg0: i32) -> (i32, i32) {
    %c0_i32 = arith.constant 0 : i32
    %c0_i32_0 = arith.constant 0 : i32
    return %arg0, %c0_i32 : i32, i32
  }
}

</mosaic_0001>

<bundles_post_ra>
// kernel: tpu_custom_call.1
= control target key start
LH: loop header
LB: loop body
LE: loop exit
PB: predicated region body
PF: predicated region fallthrough
CT: control target
= control target key end

     0   :  { %10 = vsyncpa [#allocation3], 0  ;;  %s4414_s0 = inlined_call_operand.hbm [shape: bf16[16,1024], index: 0, kind: input, shape index: {}]   ;;  %s4415_s1 = inlined_call_operand.hbm [shape: bf16[1024,384], index: 1, kind: input, shape index: {}]   ;;  %s4416_s2 = inlined_call_operand.vmem [shape: f32[1,384], index: 2, kind: input, shape index: {}]   ;;  %s4417_s3 = inlined_call_operand.hbm [shape: bf16[384,1024], index: 3, kind: input, shape index: {}]   ;;  %s4418_s4 = inlined_call_operand.vmem [shape: f32[1,1024], index: 4, kind: input, shape index: {}]   ;;  %s4419_s5 = inlined_call_operand.hbm [shape: f32[16,1024], index: 5, kind: output, shape index: {}]  }
   0x1   :  { %11 = vsyncpa [#allocation6], 0 }
   0x2   :  { %12 = vsyncpa [#allocation4], 0  ;;  %s4208_s18 = smov [#allocation5]   ;;  %s4114_s22 = scalar_lea.hbm %s4415_s1, 24576 }
   0x3   :  { %s30_s19 = sshll.u32 %s4208_s18, 4  ;;  %p4115_p0 = scmp.ne.s32.totalorder %s4415_s1, %s4114_s22  ;;  %s31_s19 = int_to_ptr.vmem [resolvable:$true] %s30_s19 }
   0x4   :  { %p4118_p1 = scmp.lt.u32.totalorder %s4114_s22, %s4415_s1 }
   0x6   :  { %p4120_p2 = pnand %p4118_p1, %p4115_p0 }
   0x8   :  { %4123 = shalt.err (!%p4120_p2)
}
   0x9   :  { %s4124_s27 = scalar_lea.vmem %s31_s19, 24576  ;;  %p4129_p4 = scmp.lt.s32.totalorder %s31_s19, %s31_s19 }
   0xa   :  { %p4125_p3 = scmp.ne.s32.totalorder %s31_s19, %s4124_s27  ;;  %p4130_p5 = scmp.lt.s32.totalorder %s4124_s27, %s4124_s27 }
   0xc   :  { %p4131_p6 = por %p4130_p5, %p4129_p4 }
   0xe   :  { %p4132_p7 = pnand %p4131_p6, %p4125_p3 }
  0x10   :  { %4135 = shalt.err (!%p4132_p7)
}
  0x11   :  { %s4209_s28 = smov 192   ;;  %s4210_s29 = smov 12  }
  0x12   :  { %36 = dma.hbm_to_vmem [thread:$0]  %s4415_s1, 24576, %s31_s19, [#allocation6], %s4209_s28, %s4209_s28, %s4210_s29  }
  0x13   :  { %s4211_s7 = smov [#allocation2]   ;;  %s4136_s11 = scalar_lea.hbm %s4414_s0, 1024 }
  0x14   :  { %s18_s8 = sshll.u32 %s4211_s7, 4  ;;  %p4137_p8 = scmp.ne.s32.totalorder %s4414_s0, %s4136_s11  ;;  %s19_s8 = int_to_ptr.vmem [resolvable:$true] %s18_s8 }
  0x15   :  { %p4140_p9 = scmp.lt.u32.totalorder %s4136_s11, %s4414_s0 }
  0x17   :  { %p4142_p10 = pnand %p4140_p9, %p4137_p8 }
  0x19   :  { %4145 = shalt.err (!%p4142_p10)
}
  0x1a   :  { %s4146_s16 = scalar_lea.vmem %s19_s8, 1024  ;;  %p4151_p12 = scmp.lt.s32.totalorder %s19_s8, %s19_s8 }
  0x1b   :  { %p4147_p11 = scmp.ne.s32.totalorder %s19_s8, %s4146_s16  ;;  %p4152_p13 = scmp.lt.s32.totalorder %s4146_s16, %s4146_s16 }
  0x1d   :  { %p4153_p0 = por %p4152_p13, %p4151_p12 }
  0x1f   :  { %p4154_p1 = pnand %p4153_p0, %p4147_p11 }
  0x21   :  { %4157 = shalt.err (!%p4154_p1)
}
  0x22   :  { %s4212_s1 = smov 512   ;;  %s4213_s17 = smov 32  }
  0x23   :  { %24 = dma.hbm_to_vmem [thread:$0]  %s4414_s0, 1024, %s19_s8, [#allocation3], %s4212_s1, %s4212_s1, %s4213_s17  }
  0x24   :  { %s4214_s20 = smov [#allocation7]   ;;  %s4158_s24 = scalar_lea.hbm %s4417_s3, 24576 }
  0x25   :  { %s44_s21 = sshll.u32 %s4214_s20, 4  ;;  %p4159_p2 = scmp.ne.s32.totalorder %s4417_s3, %s4158_s24  ;;  %s45_s21 = int_to_ptr.vmem [resolvable:$true] %s44_s21 }
  0x26   :  { %p4162_p3 = scmp.lt.u32.totalorder %s4158_s24, %s4417_s3 }
  0x28   :  { %p4164_p4 = pnand %p4162_p3, %p4159_p2 }
  0x2a   :  { %4167 = shalt.err (!%p4164_p4)
}
  0x2b   :  { %s4168_s29 = scalar_lea.vmem %s45_s21, 24576  ;;  %p4173_p6 = scmp.lt.s32.totalorder %s45_s21, %s45_s21 }
  0x2c   :  { %p4169_p5 = scmp.ne.s32.totalorder %s45_s21, %s4168_s29  ;;  %p4174_p7 = scmp.lt.s32.totalorder %s4168_s29, %s4168_s29 }
  0x2e   :  { %p4175_p8 = por %p4174_p7, %p4173_p6 }
  0x30   :  { %p4176_p9 = pnand %p4175_p8, %p4169_p5 }
  0x32   :  { %4179 = shalt.err (!%p4176_p9)
}
  0x33   :  { %50 = dma.hbm_to_vmem [thread:$0]  %s4417_s3, 24576, %s45_s21, [#allocation6], %s4212_s1, %s4212_s1, %s4213_s17  }
  0x34   :  { %4202 = dma.done.wait [#allocation3], 1024  }
  0x35   :  { %4203 = vsyncadd [#allocation3], 4294966272 }
  0x36   :  { %4204 = dma.done.wait [#allocation6], 49152  }
  0x37   :  { %4205 = vsyncadd [#allocation6], 4294918144  ;;  %v3858_v0 = vld [vmem:[#allocation5 + $0x4] ss:$12 sps:$4 sm:$0xff]   ;;  %v3860_v1 = vld [vmem:[#allocation5] ss:$12 sps:$4 sm:$0xff]  }
  0x38   :  { %1408 = vmatprep.subr.bf16.mxu0 %v3858_v0  ;;  %v3861_v2 = vld [vmem:[#allocation5 + $0x1c] ss:$12 sps:$4 sm:$0xff]   ;;  %v3863_v3 = vld [vmem:[#allocation5 + $0x18] ss:$12 sps:$4 sm:$0xff]   ;;  %v3864_v4 = vld [vmem:[#allocation5 + $0x34] ss:$12 sps:$4 sm:$0xff]  }
  0x39   :  { %1409 = vmatpush1.bf16.msra.mxu0 %v3860_v1  ;;  %v3866_v5 = vld [vmem:[#allocation5 + $0x30] ss:$12 sps:$4 sm:$0xff]   ;;  %v3867_v6 = vld [vmem:[#allocation5 + $0x4c] ss:$12 sps:$4 sm:$0xff]   ;;  %v3869_v7 = vld [vmem:[#allocation5 + $0x48] ss:$12 sps:$4 sm:$0xff]  }
  0x3a   :  { %1410 = vmatprep.subr.bf16.mxu0 %v3861_v2  ;;  %v3870_v8 = vld [vmem:[#allocation5 + $0x64] ss:$12 sps:$4 sm:$0xff]   ;;  %v3872_v9 = vld [vmem:[#allocation5 + $0x60] ss:$12 sps:$4 sm:$0xff]   ;;  %v3873_v10 = vld [vmem:[#allocation5 + $0x7c] ss:$12 sps:$4 sm:$0xff]  }
  0x3b   :  { %v3875_v11 = vld [vmem:[#allocation5 + $0x78] ss:$12 sps:$4 sm:$0xff]   ;;  %v3876_v12 = vld [vmem:[#allocation5 + $0x94] ss:$12 sps:$4 sm:$0xff]   ;;  %v3878_v16 = vld [vmem:[#allocation5 + $0x90] ss:$12 sps:$4 sm:$0xff]  }
  0x3c   :  { %v63_v13 = vld [vmem:[#allocation2] sm:$0xff]  ;;  %v3879_v17 = vld [vmem:[#allocation5 + $0xac] ss:$12 sps:$4 sm:$0xff]   ;;  %v3881_v18 = vld [vmem:[#allocation5 + $0xa8] ss:$12 sps:$4 sm:$0xff]  }
  0x3d   :  { %1411 = vmatpush1.bf16.msra.mxu0 %v3863_v3  ;;  %v67_v14 = vld [vmem:[#allocation2 + $0x20] sm:$0xff]  ;;  %v3885_v21 = vld [vmem:[#allocation5 + $0xdc] ss:$12 sps:$4 sm:$0xff]   ;;  %v3891_v25 = vld [vmem:[#allocation5 + $0x10c] ss:$12 sps:$4 sm:$0xff]  }
  0x3e   :  { %1412 = vmatprep.subr.bf16.mxu0 %v3864_v4  ;;  %v4285_v15 = vcombine.high %v63_v13, %v67_v14  ;;  %v3882_v19 = vld [vmem:[#allocation5 + $0xc4] ss:$12 sps:$4 sm:$0xff]   ;;  %v3884_v20 = vld [vmem:[#allocation5 + $0xc0] ss:$12 sps:$4 sm:$0xff]   ;;  %v3893_v26 = vld [vmem:[#allocation5 + $0x108] ss:$12 sps:$4 sm:$0xff]   ;;  %v4294_v39 = vcombine.low %v63_v13, %v67_v14 }
  0x3f   :  { %v3887_v22 = vld [vmem:[#allocation5 + $0xd8] ss:$12 sps:$4 sm:$0xff]   ;;  %v3888_v23 = vld [vmem:[#allocation5 + $0xf4] ss:$12 sps:$4 sm:$0xff]   ;;  %v3890_v24 = vld [vmem:[#allocation5 + $0xf0] ss:$12 sps:$4 sm:$0xff]  }
  0x40   :  { %1440 = vmatprep.mubr.bf16.mxu0 %v4285_v15  ;;  %v4288_v27 = vld [vmem:[#allocation2 + $0x8] sm:$0xff]  ;;  %v3894_v29 = vld [vmem:[#allocation5 + $0x124] ss:$12 sps:$4 sm:$0xff]   ;;  %v3900_v34 = vld [vmem:[#allocation5 + $0x154] ss:$12 sps:$4 sm:$0xff]  }
  0x41   :  { %1413 = vmatpush1.bf16.msra.mxu0 %v3866_v5  ;;  %v4290_v28 = vld [vmem:[#allocation2 + $0x28] sm:$0xff]  ;;  %v3899_v33 = vld [vmem:[#allocation5 + $0x138] ss:$12 sps:$4 sm:$0xff]   ;;  %v3902_v35 = vld [vmem:[#allocation5 + $0x150] ss:$12 sps:$4 sm:$0xff]  }
  0x42   :  { %1414 = vmatprep.subr.bf16.mxu0 %v3867_v6  ;;  %v3322_v30 = vcombine.high %v4288_v27, %v4290_v28  ;;  %v3896_v31 = vld [vmem:[#allocation5 + $0x120] ss:$12 sps:$4 sm:$0xff]   ;;  %v3897_v32 = vld [vmem:[#allocation5 + $0x13c] ss:$12 sps:$4 sm:$0xff]   ;;  %v3908_v38 = vld [vmem:[#allocation5 + $0x184] ss:$12 sps:$4 sm:$0xff]  }
  0x43   :  { %v3903_v36 = vld [vmem:[#allocation5 + $0x16c] ss:$12 sps:$4 sm:$0xff]   ;;  %v3905_v37 = vld [vmem:[#allocation5 + $0x168] ss:$12 sps:$4 sm:$0xff]   ;;  %v3912_v45 = vld [vmem:[#allocation5 + $0x1b0] ss:$12 sps:$4 sm:$0xff]  }
  0x44   :  { %1653 = vmatprep.mubr.bf16.mxu1 %v3322_v30  ;;  %v3906_v40 = vld [vmem:[#allocation5 + $0x180] ss:$12 sps:$4 sm:$0xff]   ;;  %v3911_v41 = vld [vmem:[#allocation5 + $0x19c] ss:$12 sps:$4 sm:$0xff]   ;;  %v3909_v42 = vld [vmem:[#allocation5 + $0x198] ss:$12 sps:$4 sm:$0xff]  }
  0x45   :  { %1415 = vmatpush1.bf16.msra.mxu0 %v3869_v7  ;;  %v3914_v43 = vld [vmem:[#allocation5 + $0x1b4] ss:$12 sps:$4 sm:$0xff]   ;;  %v3917_v48 = vld [vmem:[#allocation5 + $0x1cc] ss:$12 sps:$4 sm:$0xff]   ;;  %v3920_v52 = vld [vmem:[#allocation5 + $0x1e4] ss:$12 sps:$4 sm:$0xff]  }
  0x46   :  { %1416 = vmatprep.subr.bf16.mxu0 %v3870_v8  ;;  %v4005_v44 = vld [vmem:[#allocation5 + $0x248] ss:$12 sps:$4 sm:$0xff]   ;;  %v4010_v47 = vld [vmem:[#allocation5 + $0x260] ss:$12 sps:$4 sm:$0xff]   ;;  %v4015_v51 = vld [vmem:[#allocation5 + $0x278] ss:$12 sps:$4 sm:$0xff]  }
  0x47   :  { %3733 = vmatprep.subr.bf16.mxu1 %v4005_v44  ;;  %v4009_v46 = vld [vmem:[#allocation5 + $0x188] ss:$12 sps:$4 sm:$0xff]   ;;  %v4014_v49 = vld [vmem:[#allocation5 + $0x1a0] ss:$12 sps:$4 sm:$0xff]   ;;  %v4019_v53 = vld [vmem:[#allocation5 + $0x1b8] ss:$12 sps:$4 sm:$0xff]  }
  0x48   :  { %3734 = vmatpush3.bf16.msra.mxu1 %v4009_v46  ;;  %v3915_v50 = vld [vmem:[#allocation5 + $0x1c8] ss:$12 sps:$4 sm:$0xff]   ;;  %v3918_v54 = vld [vmem:[#allocation5 + $0x1e0] ss:$12 sps:$4 sm:$0xff]   ;;  %v4020_v56 = vld [vmem:[#allocation5 + $0x290] ss:$12 sps:$4 sm:$0xff]  }
  0x49   :  { %1417 = vmatpush1.bf16.msra.mxu0 %v3872_v9  ;;  %3735 = vmatprep.subr.bf16.mxu1 %v4010_v47  ;;  %v3923_v55 = vld [vmem:[#allocation5 + $0x1fc] ss:$12 sps:$4 sm:$0xff]   ;;  %v3921_v58 = vld [vmem:[#allocation5 + $0x1f8] ss:$12 sps:$4 sm:$0xff]   ;;  %v3926_v59 = vld [vmem:[#allocation5 + $0x214] ss:$12 sps:$4 sm:$0xff]  }
  0x4a   :  { %1418 = vmatprep.subr.bf16.mxu0 %v3873_v10  ;;  %v4024_v57 = vld [vmem:[#allocation5 + $0x1d0] ss:$12 sps:$4 sm:$0xff]   ;;  %v4025_v60 = vld [vmem:[#allocation5 + $0x2a8] ss:$12 sps:$4 sm:$0xff]   ;;  %v3929_v63 = vld [vmem:[#allocation5 + $0x22c] ss:$12 sps:$4 sm:$0xff]  }
  0x4b   :  { %v4029_v61 = vld [vmem:[#allocation5 + $0x1e8] ss:$12 sps:$4 sm:$0xff]   ;;  %v3924_v62 = vld [vmem:[#allocation5 + $0x210] ss:$12 sps:$4 sm:$0xff]   ;;  %v4030_v0 = vld [vmem:[#allocation5 + $0x2c0] ss:$12 sps:$4 sm:$0xff]  }
  0x4c   :  { %3736 = vmatpush3.bf16.msra.mxu1 %v4014_v49  ;;  %v4034_v1 = vld [vmem:[#allocation5 + $0x200] ss:$12 sps:$4 sm:$0xff]   ;;  %v3927_v2 = vld [vmem:[#allocation5 + $0x228] ss:$12 sps:$4 sm:$0xff]   ;;  %v3932_v3 = vld [vmem:[#allocation5 + $0x244] ss:$12 sps:$4 sm:$0xff]  }
  0x4d   :  { %1419 = vmatpush1.bf16.msra.mxu0 %v3875_v11  ;;  %3737 = vmatprep.subr.bf16.mxu1 %v4015_v51  ;;  %v4035_v4 = vld [vmem:[#allocation5 + $0x2d8] ss:$12 sps:$4 sm:$0xff]   ;;  %v3930_v6 = vld [vmem:[#allocation5 + $0x240] ss:$12 sps:$4 sm:$0xff]   ;;  %v3935_v7 = vld [vmem:[#allocation5 + $0x25c] ss:$12 sps:$4 sm:$0xff]  }
  0x4e   :  { %1420 = vmatprep.subr.bf16.mxu0 %v3876_v12  ;;  %v4039_v5 = vld [vmem:[#allocation5 + $0x218] ss:$12 sps:$4 sm:$0xff]   ;;  %v4040_v8 = vld [vmem:[#allocation5 + $0x2f0] ss:$12 sps:$4 sm:$0xff]   ;;  %v3938_v11 = vld [vmem:[#allocation5 + $0x274] ss:$12 sps:$4 sm:$0xff]  }
  0x4f   :  { %v4044_v9 = vld [vmem:[#allocation5 + $0x230] ss:$12 sps:$4 sm:$0xff]   ;;  %v3933_v10 = vld [vmem:[#allocation5 + $0x258] ss:$12 sps:$4 sm:$0xff]   ;;  %v4045_v14 = vld [vmem:[#allocation5 + $0x3c8] ss:$12 sps:$4 sm:$0xff]  }
  0x50   :  { %3738 = vmatpush3.bf16.msra.mxu1 %v4019_v53  ;;  %v4297_v12 = vld [vmem:[#allocation2 + $0x10] sm:$0xff]  ;;  %v3954_v44 = vld [vmem:[#allocation5 + $0x300] ss:$12 sps:$4 sm:$0xff]   ;;  %v3959_v46 = vld [vmem:[#allocation5 + $0x31c] ss:$12 sps:$4 sm:$0xff]  }
  0x51   :  { %1421 = vmatpush1.bf16.msra.mxu0 %v3878_v16  ;;  %3739 = vmatprep.subr.bf16.mxu1 %v4020_v56  ;;  %v4299_v13 = vld [vmem:[#allocation2 + $0x30] sm:$0xff] }
  0x52   :  { %1422 = vmatprep.subr.bf16.mxu0 %v3879_v17  ;;  %v4049_v16 = vld [vmem:[#allocation5 + $0x308] ss:$12 sps:$4 sm:$0xff]   ;;  %v3321_v17 = vcombine.low %v4288_v27, %v4290_v28  ;;  %v3942_v27 = vld [vmem:[#allocation5 + $0x2a0] ss:$12 sps:$4 sm:$0xff]   ;;  %v4082_v47 = vld [vmem:[#allocation5 + $0x3b0] ss:$12 sps:$4 sm:$0xff]  }
  0x53   :  { %v3947_v28 = vld [vmem:[#allocation5 + $0x2bc] ss:$12 sps:$4 sm:$0xff]   ;;  %v3962_v49 = vld [vmem:[#allocation5 + $0x334] ss:$12 sps:$4 sm:$0xff]  }
  0x54   :  { %3740 = vmatpush3.bf16.msra.mxu1 %v4024_v57  ;;  %v4084_v51 = vld [vmem:[#allocation5 + $0x548] ss:$12 sps:$4 sm:$0xff]   ;;  %v4088_v57 = vld [vmem:[#allocation5 + $0x560] ss:$12 sps:$4 sm:$0xff]  }
  0x55   :  { %1423 = vmatpush1.bf16.msra.mxu0 %v3881_v18  ;;  %3741 = vmatprep.subr.bf16.mxu1 %v4025_v60  ;;  %v3936_v18 = vld [vmem:[#allocation5 + $0x270] ss:$12 sps:$4 sm:$0xff]   ;;  %v4086_v53 = vld [vmem:[#allocation5 + $0x488] ss:$12 sps:$4 sm:$0xff]  }
  0x56   :  { %1424 = vmatprep.subr.bf16.mxu0 %v3882_v19  ;;  %v3941_v19 = vld [vmem:[#allocation5 + $0x28c] ss:$12 sps:$4 sm:$0xff]   ;;  %v3963_v60 = vld [vmem:[#allocation5 + $0x348] ss:$12 sps:$4 sm:$0xff]  }
  0x58   :  { %3742 = vmatpush3.bf16.msra.mxu1 %v4029_v61  ;;  %v4092_v61 = vld [vmem:[#allocation5 + $0x578] ss:$12 sps:$4 sm:$0xff]  }
  0x59   :  { %1425 = vmatpush1.bf16.msra.mxu0 %v3884_v20  ;;  %3743 = vmatprep.subr.bf16.mxu1 %v4030_v0  ;;  %v3324_v20 = vcombine.high %v4297_v12, %v4299_v13  ;;  %v3966_v0 = vld [vmem:[#allocation5 + $0x360] ss:$12 sps:$4 sm:$0xff]  }
  0x5a   :  { %1426 = vmatprep.subr.bf16.mxu0 %v3885_v21  ;;  %v4050_v21 = vld [vmem:[#allocation5 + $0x3e0] ss:$12 sps:$4 sm:$0xff]  }
  0x5c   :  { %3744 = vmatpush3.bf16.msra.mxu1 %v4034_v1  ;;  %v4096_v1 = vld [vmem:[#allocation5 + $0x590] ss:$12 sps:$4 sm:$0xff]  }
  0x5d   :  { %1427 = vmatpush1.bf16.msra.mxu0 %v3887_v22  ;;  %3745 = vmatprep.subr.bf16.mxu1 %v4035_v4  ;;  %v4054_v22 = vld [vmem:[#allocation5 + $0x320] ss:$12 sps:$4 sm:$0xff]   ;;  %v3969_v4 = vld [vmem:[#allocation5 + $0x378] ss:$12 sps:$4 sm:$0xff]  }
  0x5e   :  { %1428 = vmatprep.subr.bf16.mxu0 %v3888_v23  ;;  %v3939_v23 = vld [vmem:[#allocation5 + $0x288] ss:$12 sps:$4 sm:$0xff]  }
  0x60   :  { %3746 = vmatpush3.bf16.msra.mxu1 %v4039_v5  ;;  %v4100_v5 = vld [vmem:[#allocation5 + $0x5a8] ss:$12 sps:$4 sm:$0xff]  }
  0x61   :  { %1429 = vmatpush1.bf16.msra.mxu0 %v3890_v24  ;;  %3747 = vmatprep.subr.bf16.mxu1 %v4040_v8  ;;  %v3944_v24 = vld [vmem:[#allocation5 + $0x2a4] ss:$12 sps:$4 sm:$0xff]  }
  0x62   :  { %1430 = vmatprep.subr.bf16.mxu0 %v3891_v25  ;;  %v4055_v25 = vld [vmem:[#allocation5 + $0x3f8] ss:$12 sps:$4 sm:$0xff]   ;;  %v3972_v8 = vld [vmem:[#allocation5 + $0x390] ss:$12 sps:$4 sm:$0xff]  }
  0x64   :  { %3748 = vmatpush3.bf16.msra.mxu1 %v4044_v9  ;;  %v4104_v9 = vld [vmem:[#allocation5 + $0x5c0] ss:$12 sps:$4 sm:$0xff]  }
  0x65   :  { %1431 = vmatpush1.bf16.msra.mxu0 %v3893_v26  ;;  %3755 = vmatprep.subr.bf16.mxu1 %v4045_v14  ;;  %v4059_v26 = vld [vmem:[#allocation5 + $0x338] ss:$12 sps:$4 sm:$0xff]  }
  0x66   :  { %1432 = vmatprep.subr.bf16.mxu0 %v3894_v29  ;;  %v4060_v29 = vld [vmem:[#allocation5 + $0x410] ss:$12 sps:$4 sm:$0xff]  }
  0x67   :  { %1654 = vmatmul.mubr.bf16.vlgmr.msra.gmra.mrb[0].mxu1 %v3321_v17  ;;  %v3980_v14 = vld [vmem:[#allocation5 + $0x3c4] ss:$12 sps:$4 sm:$0xff]  }
  0x68   :  { %3756 = vmatpush3.bf16.msra.mxu1 %v4049_v16  ;;  %1694 = vmatprep.mubr.bf16.mxu1 %v3324_v20  ;;  %v4110_v16 = vld [vmem:[#allocation5 + $0x518] ss:$12 sps:$4 sm:$0xff]  }
  0x69   :  { %1433 = vmatpush1.bf16.msra.mxu0 %v3896_v31  ;;  %3757 = vmatprep.subr.bf16.mxu1 %v4050_v21  ;;  %v3945_v31 = vld [vmem:[#allocation5 + $0x2b8] ss:$12 sps:$4 sm:$0xff]  }
  0x6a   :  { %1434 = vmatprep.subr.bf16.mxu0 %v3897_v32  ;;  %v3950_v32 = vld [vmem:[#allocation5 + $0x2d4] ss:$12 sps:$4 sm:$0xff]  }
  0x6b   :  { %v1747_v21 = vld [vmem:[#allocation7] sm:$0xff] }
  0x6c   :  { %3758 = vmatpush3.bf16.msra.mxu1 %v4054_v22  ;;  %v1751_v22 = vld [vmem:[#allocation7 + $0x20] sm:$0xff] }
  0x6d   :  { %1435 = vmatpush1.bf16.msra.mxu0 %v3899_v33  ;;  %3759 = vmatprep.subr.bf16.mxu1 %v4055_v25  ;;  %v4065_v33 = vld [vmem:[#allocation5 + $0x428] ss:$12 sps:$4 sm:$0xff]   ;;  %v1755_v25 = vld [vmem:[#allocation7 + $0x40] sm:$0xff] }
  0x6e   :  { %1436 = vmatprep.subr.bf16.mxu0 %v3900_v34  ;;  %v4069_v34 = vld [vmem:[#allocation5 + $0x368] ss:$12 sps:$4 sm:$0xff]  }
  0x70   :  { %3760 = vmatpush3.bf16.msra.mxu1 %v4059_v26  ;;  %v1759_v26 = vld [vmem:[#allocation7 + $0x60] sm:$0xff] }
  0x71   :  { %1437 = vmatpush1.bf16.msra.mxu0 %v3902_v35  ;;  %3761 = vmatprep.subr.bf16.mxu1 %v4060_v29  ;;  %v3948_v35 = vld [vmem:[#allocation5 + $0x2d0] ss:$12 sps:$4 sm:$0xff]  }
  0x72   :  { %1438 = vmatprep.subr.bf16.mxu0 %v3903_v36  ;;  %v3953_v36 = vld [vmem:[#allocation5 + $0x2ec] ss:$12 sps:$4 sm:$0xff]  }
  0x75   :  { %1439 = vmatpush1.bf16.msra.mxu0 %v3905_v37  ;;  %v4070_v37 = vld [vmem:[#allocation5 + $0x440] ss:$12 sps:$4 sm:$0xff]  }
  0x76   :  { %1451 = vmatprep.subr.bf16.mxu0 %v3908_v38  ;;  %v4074_v38 = vld [vmem:[#allocation5 + $0x380] ss:$12 sps:$4 sm:$0xff]  }
  0x78   :  { %1441 = vmatmul.mubr.bf16.vlgmr.msra.gmra.mrb[0].mxu0 %v4294_v39 }
  0x79   :  { %1452 = vmatpush1.bf16.msra.mxu0 %v3906_v40  ;;  %1483 = vmatprep.mubr.bf16.mxu0 %v3322_v30  ;;  %v4064_v30 = vld [vmem:[#allocation5 + $0x350] ss:$12 sps:$4 sm:$0xff]   ;;  %v3951_v40 = vld [vmem:[#allocation5 + $0x2e8] ss:$12 sps:$4 sm:$0xff]  }
  0x7a   :  { %1453 = vmatprep.subr.bf16.mxu0 %v3911_v41  ;;  %3762 = vmatpush3.bf16.msra.mxu1 %v4064_v30  ;;  %v3956_v41 = vld [vmem:[#allocation5 + $0x304] ss:$12 sps:$4 sm:$0xff]   ;;  %v3528_v30 = vcombine.high %v1755_v25, %v1759_v26 }
  0x7b   :  { %3763 = vmatprep.subr.bf16.mxu1 %v4065_v33  ;;  %v1767_v33 = vld [vmem:[#allocation7 + $0xa0] sm:$0xff] }
  0x7d   :  { %1454 = vmatpush1.bf16.msra.mxu0 %v3909_v42  ;;  %v4075_v42 = vld [vmem:[#allocation5 + $0x458] ss:$12 sps:$4 sm:$0xff]  }
  0x7e   :  { %1455 = vmatprep.subr.bf16.mxu0 %v3914_v43  ;;  %3764 = vmatpush3.bf16.msra.mxu1 %v4069_v34  ;;  %v4079_v43 = vld [vmem:[#allocation5 + $0x398] ss:$12 sps:$4 sm:$0xff]  }
  0x7f   :  { %3765 = vmatprep.subr.bf16.mxu1 %v4070_v37  ;;  %v3989_v34 = vld [vmem:[#allocation5 + $0x40c] ss:$12 sps:$4 sm:$0xff]   ;;  %v3987_v37 = vld [vmem:[#allocation5 + $0x408] ss:$12 sps:$4 sm:$0xff]  }
  0x81   :  { %1456 = vmatpush1.bf16.msra.mxu0 %v3912_v45  ;;  %v4080_v45 = vld [vmem:[#allocation5 + $0x470] ss:$12 sps:$4 sm:$0xff]  }
  0x82   :  { %1457 = vmatprep.subr.bf16.mxu0 %v3917_v48  ;;  %3766 = vmatpush3.bf16.msra.mxu1 %v4074_v38  ;;  %v3957_v48 = vld [vmem:[#allocation5 + $0x318] ss:$12 sps:$4 sm:$0xff]  }
  0x83   :  { %3767 = vmatprep.subr.bf16.mxu1 %v4075_v42  ;;  %v1771_v38 = vld [vmem:[#allocation7 + $0xc0] sm:$0xff] }
  0x85   :  { %1458 = vmatpush1.bf16.msra.mxu0 %v3915_v50  ;;  %v4305_v50 = vld [vmem:[#allocation2 + $0x18] sm:$0xff] }
  0x86   :  { %1459 = vmatprep.subr.bf16.mxu0 %v3920_v52  ;;  %3768 = vmatpush3.bf16.msra.mxu1 %v4079_v43  ;;  %v4307_v52 = vld [vmem:[#allocation2 + $0x38] sm:$0xff] }
  0x87   :  { %3769 = vmatprep.subr.bf16.mxu1 %v4080_v45  ;;  %v4315_v56 = vcombine.high %v4305_v50, %v4307_v52  ;;  %v4321_v29 = vcombine.low %v4305_v50, %v4307_v52  ;;  %v1779_v45 = vld [vmem:[#allocation7 + $0x100] sm:$0xff] }
  0x88   :  { %v3993_v50 = vld [vmem:[#allocation5 + $0x438] ss:$12 sps:$4 sm:$0xff]  }
  0x89   :  { %1460 = vmatpush1.bf16.msra.mxu0 %v3918_v54  ;;  %v4311_v54 = vcombine.low %v4297_v12, %v4299_v13  ;;  %v3975_v12 = vld [vmem:[#allocation5 + $0x3a8] ss:$12 sps:$4 sm:$0xff]   ;;  %v4108_v13 = vld [vmem:[#allocation5 + $0x5d8] ss:$12 sps:$4 sm:$0xff]  }
  0x8a   :  { %1461 = vmatprep.subr.bf16.mxu0 %v3923_v55  ;;  %3770 = vmatpush3.bf16.msra.mxu1 %v4082_v47  ;;  %v3960_v55 = vld [vmem:[#allocation5 + $0x330] ss:$12 sps:$4 sm:$0xff]   ;;  %v1791_v52 = vld [vmem:[#allocation7 + $0x160] sm:$0xff] }
  0x8b   :  { %3777 = vmatprep.subr.bf16.mxu1 %v4084_v51  ;;  %v3995_v47 = vld [vmem:[#allocation5 + $0x43c] ss:$12 sps:$4 sm:$0xff]   ;;  %v1787_v51 = vld [vmem:[#allocation7 + $0x140] sm:$0xff] }
  0x8d   :  { %1462 = vmatpush1.bf16.msra.mxu0 %v3921_v58  ;;  %1695 = vmatmul.mubr.bf16.vlgmr.msra.gmra.mrb[4].mxu1 %v4311_v54  ;;  %v3965_v58 = vld [vmem:[#allocation5 + $0x34c] ss:$12 sps:$4 sm:$0xff]  }
  0x8e   :  { %1463 = vmatprep.subr.bf16.mxu0 %v3926_v59  ;;  %3778 = vmatpush3.bf16.msra.mxu1 %v4086_v53  ;;  %v4090_v59 = vld [vmem:[#allocation5 + $0x4a0] ss:$12 sps:$4 sm:$0xff]  }
  0x8f   :  { %3779 = vmatprep.subr.bf16.mxu1 %v4088_v57  ;;  %1735 = vmatprep.mubr.bf16.mxu1 %v4315_v56  ;;  %v3998_v53 = vld [vmem:[#allocation5 + $0x454] ss:$12 sps:$4 sm:$0xff]   ;;  %v3560_v57 = vcombine.high %v1787_v51, %v1791_v52 }
  0x91   :  { %1464 = vmatpush1.bf16.msra.mxu0 %v3924_v62  ;;  %v3968_v62 = vld [vmem:[#allocation5 + $0x364] ss:$12 sps:$4 sm:$0xff]  }
  0x92   :  { %1465 = vmatprep.subr.bf16.mxu0 %v3929_v63  ;;  %3780 = vmatpush3.bf16.msra.mxu1 %v4090_v59  ;;  %v4094_v63 = vld [vmem:[#allocation5 + $0x4b8] ss:$12 sps:$4 sm:$0xff]  }
  0x93   :  { %3781 = vmatprep.subr.bf16.mxu1 %v4092_v61  ;;  %v1795_v59 = vld [vmem:[#allocation7 + $0x180] sm:$0xff]  ;;  %v4001_v61 = vld [vmem:[#allocation5 + $0x46c] ss:$12 sps:$4 sm:$0xff]  }
  0x95   :  { %1466 = vmatpush1.bf16.msra.mxu0 %v3927_v2  ;;  %v3971_v2 = vld [vmem:[#allocation5 + $0x37c] ss:$12 sps:$4 sm:$0xff]  }
  0x96   :  { %1467 = vmatprep.subr.bf16.mxu0 %v3932_v3  ;;  %3782 = vmatpush3.bf16.msra.mxu1 %v4094_v63  ;;  %v4098_v3 = vld [vmem:[#allocation5 + $0x4d0] ss:$12 sps:$4 sm:$0xff]  }
  0x97   :  { %3783 = vmatprep.subr.bf16.mxu1 %v4096_v1  ;;  %v4004_v1 = vld [vmem:[#allocation5 + $0x484] ss:$12 sps:$4 sm:$0xff]  }
  0x99   :  { %1468 = vmatpush1.bf16.msra.mxu0 %v3930_v6  ;;  %v3974_v6 = vld [vmem:[#allocation5 + $0x394] ss:$12 sps:$4 sm:$0xff]  }
  0x9a   :  { %1469 = vmatprep.subr.bf16.mxu0 %v3935_v7  ;;  %3784 = vmatpush3.bf16.msra.mxu1 %v4098_v3  ;;  %v4102_v7 = vld [vmem:[#allocation5 + $0x4e8] ss:$12 sps:$4 sm:$0xff]   ;;  %v1803_v3 = vld [vmem:[#allocation7 + $0x1c0] sm:$0xff] }
  0x9b   :  { %3785 = vmatprep.subr.bf16.mxu1 %v4100_v5 }
  0x9d   :  { %1470 = vmatpush1.bf16.msra.mxu0 %v3933_v10  ;;  %v3977_v10 = vld [vmem:[#allocation5 + $0x3ac] ss:$12 sps:$4 sm:$0xff]  }
  0x9e   :  { %1471 = vmatprep.subr.bf16.mxu0 %v3938_v11  ;;  %3786 = vmatpush3.bf16.msra.mxu1 %v4102_v7  ;;  %v4106_v11 = vld [vmem:[#allocation5 + $0x500] ss:$12 sps:$4 sm:$0xff]  }
  0x9f   :  { %3787 = vmatprep.subr.bf16.mxu1 %v4104_v9  ;;  %v1811_v7 = vld [vmem:[#allocation7 + $0x200] sm:$0xff]  ;;  %v4008_v9 = vld [vmem:[#allocation5 + $0x49c] ss:$12 sps:$4 sm:$0xff]  }
  0xa1   :  { %1472 = vmatpush1.bf16.msra.mxu0 %v3936_v18  ;;  %v4112_v18 = vld [vmem:[#allocation5 + $0x5f0] ss:$12 sps:$4 sm:$0xff]  }
  0xa2   :  { %1473 = vmatprep.subr.bf16.mxu0 %v3941_v19  ;;  %3788 = vmatpush3.bf16.msra.mxu1 %v4106_v11  ;;  %v3983_v19 = vld [vmem:[#allocation5 + $0x3dc] ss:$12 sps:$4 sm:$0xff]  }
  0xa3   :  { %3789 = vmatprep.subr.bf16.mxu1 %v4108_v13  ;;  %v1819_v13 = vld [vmem:[#allocation7 + $0x240] sm:$0xff] }
  0xa5   :  { %1474 = vmatpush1.bf16.msra.mxu0 %v3939_v23  ;;  %v3981_v23 = vld [vmem:[#allocation5 + $0x3d8] ss:$12 sps:$4 sm:$0xff]  }
  0xa6   :  { %1475 = vmatprep.subr.bf16.mxu0 %v3944_v24  ;;  %3790 = vmatpush3.bf16.msra.mxu1 %v4110_v16  ;;  %v3520_v24 = vcombine.high %v1747_v21, %v1751_v22  ;;  %v4013_v16 = vld [vmem:[#allocation5 + $0x4b4] ss:$12 sps:$4 sm:$0xff]  }
  0xa7   :  { %3791 = vmatprep.subr.bf16.mxu1 %v4112_v18 }
  0xa9   :  { %1476 = vmatpush1.bf16.msra.mxu0 %v3942_v27  ;;  %v3986_v27 = vld [vmem:[#allocation5 + $0x3f4] ss:$12 sps:$4 sm:$0xff]  }
  0xaa   :  { %1477 = vmatprep.subr.bf16.mxu0 %v3947_v28  ;;  %v3519_v28 = vcombine.low %v1747_v21, %v1751_v22  ;;  %v1831_v21 = vld [vmem:[#allocation7 + $0x2a0] sm:$0xff]  ;;  %v4018_v22 = vld [vmem:[#allocation5 + $0x4cc] ss:$12 sps:$4 sm:$0xff]  }
  0xad   :  { %1478 = vmatpush1.bf16.msra.mxu0 %v3945_v31  ;;  %v3984_v31 = vld [vmem:[#allocation5 + $0x3f0] ss:$12 sps:$4 sm:$0xff]  }
  0xae   :  { %1479 = vmatprep.subr.bf16.mxu0 %v3950_v32  ;;  %v1763_v32 = vld [vmem:[#allocation7 + $0x80] sm:$0xff] }
  0xaf   :  { %v3535_v42 = vcombine.low %v1763_v32, %v1767_v33 }
  0xb1   :  { %1480 = vmatpush1.bf16.msra.mxu0 %v3948_v35  ;;  %v3527_v35 = vcombine.low %v1755_v25, %v1759_v26  ;;  %v1839_v25 = vld [vmem:[#allocation7 + $0x2e0] sm:$0xff] }
  0xb2   :  { %1481 = vmatprep.subr.bf16.mxu0 %v3953_v36  ;;  %v3536_v36 = vcombine.high %v1763_v32, %v1767_v33  ;;  %v4023_v26 = vld [vmem:[#allocation5 + $0x4e4] ss:$12 sps:$4 sm:$0xff]   ;;  %v4028_v33 = vld [vmem:[#allocation5 + $0x4fc] ss:$12 sps:$4 sm:$0xff]  }
  0xb3   :  { %v1847_v32 = vld [vmem:[#allocation7 + $0x320] sm:$0xff] }
  0xb5   :  { %1482 = vmatpush1.bf16.msra.mxu0 %v3951_v40  ;;  %v1775_v40 = vld [vmem:[#allocation7 + $0xe0] sm:$0xff] }
  0xb6   :  { %1494 = vmatprep.subr.bf16.mxu0 %v3956_v41  ;;  %v3992_v41 = vld [vmem:[#allocation5 + $0x424] ss:$12 sps:$4 sm:$0xff]   ;;  %v3544_v43 = vcombine.high %v1771_v38, %v1775_v40 }
  0xb8   :  { %1484 = vmatmul.mubr.bf16.vlgmr.msra.gmra.mrb[0].mxu0 %v3321_v17  ;;  %v3978_v17 = vld [vmem:[#allocation5 + $0x3c0] ss:$12 sps:$4 sm:$0xff]  }
  0xb9   :  { %1495 = vmatpush1.bf16.msra.mxu0 %v3954_v44  ;;  %1526 = vmatprep.mubr.bf16.mxu0 %v3324_v20  ;;  %v4113_v20 = vld [vmem:[#allocation5 + $0x530] ss:$12 sps:$4 sm:$0xff]   ;;  %v3990_v44 = vld [vmem:[#allocation5 + $0x420] ss:$12 sps:$4 sm:$0xff]  }
  0xba   :  { %1496 = vmatprep.subr.bf16.mxu0 %v3959_v46  ;;  %3792 = vmatpush3.bf16.msra.mxu1 %v4113_v20  ;;  %v1783_v46 = vld [vmem:[#allocation7 + $0x120] sm:$0xff] }
  0xbb   :  { %2941 = vmatprep.subr.bf16.mxu1 %v3520_v24  ;;  %v1827_v20 = vld [vmem:[#allocation7 + $0x280] sm:$0xff] }
  0xbc   :  { %v1835_v24 = vld [vmem:[#allocation7 + $0x2c0] sm:$0xff] }
  0xbd   :  { %1497 = vmatpush1.bf16.msra.mxu0 %v3957_v48  ;;  %1736 = vmatmul.mubr.bf16.vlgmr.msra.gmra.mrb[8].mxu1 %v4321_v29  ;;  %v3543_v48 = vcombine.low %v1771_v38, %v1775_v40  ;;  %v1855_v38 = vld [vmem:[#allocation7 + $0x360] sm:$0xff] }
  0xbe   :  { %1498 = vmatprep.subr.bf16.mxu0 %v3962_v49  ;;  %2942 = vmatpush1.bf16.msra.mxu1 %v3519_v28  ;;  %v3552_v49 = vcombine.high %v1779_v45, %v1783_v46  ;;  %v3608_v28 = vcombine.high %v1835_v24, %v1839_v25  ;;  %v4033_v40 = vld [vmem:[#allocation5 + $0x514] ss:$12 sps:$4 sm:$0xff]  }
  0xbf   :  { %2943 = vmatprep.subr.bf16.mxu1 %v3528_v30  ;;  %v4021_v30 = vld [vmem:[#allocation5 + $0x4e0] ss:$12 sps:$4 sm:$0xff]  }
  0xc1   :  { %1499 = vmatpush1.bf16.msra.mxu0 %v3960_v55  ;;  %v3551_v55 = vcombine.low %v1779_v45, %v1783_v46  ;;  %v4036_v46 = vld [vmem:[#allocation5 + $0x528] ss:$12 sps:$4 sm:$0xff]  }
  0xc2   :  { %1500 = vmatprep.subr.bf16.mxu0 %v3965_v58  ;;  %2944 = vmatpush1.bf16.msra.mxu1 %v3527_v35  ;;  %v3996_v58 = vld [vmem:[#allocation5 + $0x450] ss:$12 sps:$4 sm:$0xff]  }
  0xc3   :  { %2945 = vmatprep.subr.bf16.mxu1 %v3536_v36  ;;  %v4026_v36 = vld [vmem:[#allocation5 + $0x4f8] ss:$12 sps:$4 sm:$0xff]  }
  0xc5   :  { %1501 = vmatpush1.bf16.msra.mxu0 %v3963_v60  ;;  %v1799_v60 = vld [vmem:[#allocation7 + $0x1a0] sm:$0xff] }
  0xc6   :  { %1502 = vmatprep.subr.bf16.mxu0 %v3968_v62  ;;  %2946 = vmatpush1.bf16.msra.mxu1 %v3535_v42  ;;  %v3559_v62 = vcombine.low %v1787_v51, %v1791_v52  ;;  %v3568_v63 = vcombine.high %v1795_v59, %v1799_v60  ;;  %v4053_v51 = vld [vmem:[#allocation5 + $0x574] ss:$12 sps:$4 sm:$0xff]   ;;  %v4051_v52 = vld [vmem:[#allocation5 + $0x570] ss:$12 sps:$4 sm:$0xff]  }
  0xc7   :  { %2947 = vmatprep.subr.bf16.mxu1 %v3544_v43  ;;  %v4031_v43 = vld [vmem:[#allocation5 + $0x510] ss:$12 sps:$4 sm:$0xff]  }
  0xc9   :  { %1503 = vmatpush1.bf16.msra.mxu0 %v3966_v0  ;;  %v3999_v0 = vld [vmem:[#allocation5 + $0x468] ss:$12 sps:$4 sm:$0xff]  }
  0xca   :  { %1504 = vmatprep.subr.bf16.mxu0 %v3971_v2  ;;  %2948 = vmatpush1.bf16.msra.mxu1 %v3543_v48  ;;  %v3567_v2 = vcombine.low %v1795_v59, %v1799_v60  ;;  %v4041_v48 = vld [vmem:[#allocation5 + $0x540] ss:$12 sps:$4 sm:$0xff]   ;;  %v4068_v59 = vld [vmem:[#allocation5 + $0x5bc] ss:$12 sps:$4 sm:$0xff]   ;;  %v4066_v60 = vld [vmem:[#allocation5 + $0x5b8] ss:$12 sps:$4 sm:$0xff]  }
  0xcb   :  { %2949 = vmatprep.subr.bf16.mxu1 %v3552_v49  ;;  %v4048_v49 = vld [vmem:[#allocation5 + $0x55c] ss:$12 sps:$4 sm:$0xff]  }
  0xcd   :  { %1505 = vmatpush1.bf16.msra.mxu0 %v3969_v4  ;;  %v1807_v4 = vld [vmem:[#allocation7 + $0x1e0] sm:$0xff] }
  0xce   :  { %1506 = vmatprep.subr.bf16.mxu0 %v3974_v6  ;;  %2950 = vmatpush1.bf16.msra.mxu1 %v3551_v55  ;;  %v3576_v5 = vcombine.high %v1803_v3, %v1807_v4  ;;  %v4002_v6 = vld [vmem:[#allocation5 + $0x480] ss:$12 sps:$4 sm:$0xff]   ;;  %v4056_v55 = vld [vmem:[#allocation5 + $0x588] ss:$12 sps:$4 sm:$0xff]  }
  0xcf   :  { %2951 = vmatprep.subr.bf16.mxu1 %v3560_v57  ;;  %v4063_v57 = vld [vmem:[#allocation5 + $0x5a4] ss:$12 sps:$4 sm:$0xff]  }
  0xd1   :  { %1507 = vmatpush1.bf16.msra.mxu0 %v3972_v8  ;;  %v1815_v8 = vld [vmem:[#allocation7 + $0x220] sm:$0xff] }
  0xd2   :  { %1508 = vmatprep.subr.bf16.mxu0 %v3977_v10  ;;  %2952 = vmatpush1.bf16.msra.mxu1 %v3559_v62  ;;  %v3575_v10 = vcombine.low %v1803_v3, %v1807_v4  ;;  %v3584_v11 = vcombine.high %v1811_v7, %v1815_v8  ;;  %v4071_v62 = vld [vmem:[#allocation5 + $0x5d0] ss:$12 sps:$4 sm:$0xff]   ;;  %v4085_v3 = vld [vmem:[#allocation5 + $0xe0] ss:$12 sps:$4 sm:$0xff]  }
  0xd3   :  { %2953 = vmatprep.subr.bf16.mxu1 %v3568_v63  ;;  %v4078_v63 = vld [vmem:[#allocation5 + $0x5ec] ss:$12 sps:$4 sm:$0xff]  }
  0xd4   :  { %v4087_v4 = vld [vmem:[#allocation5 + $0x20] ss:$12 sps:$4 sm:$0xff]  }
  0xd5   :  { %1509 = vmatpush1.bf16.msra.mxu0 %v3975_v12  ;;  %v4006_v12 = vld [vmem:[#allocation5 + $0x498] ss:$12 sps:$4 sm:$0xff]  }
  0xd6   :  { %1510 = vmatprep.subr.bf16.mxu0 %v3980_v14  ;;  %2954 = vmatpush1.bf16.msra.mxu1 %v3567_v2  ;;  %v1823_v14 = vld [vmem:[#allocation7 + $0x260] sm:$0xff]  ;;  %v4083_v2 = vld [vmem:[#allocation5 + $0x8] ss:$12 sps:$4 sm:$0xff]  }
  0xd7   :  { %2955 = vmatprep.subr.bf16.mxu1 %v3576_v5  ;;  %v3592_v18 = vcombine.high %v1819_v13, %v1823_v14  ;;  %v4089_v5 = vld [vmem:[#allocation5 + $0xf8] ss:$12 sps:$4 sm:$0xff]  }
  0xd9   :  { %1511 = vmatpush1.bf16.msra.mxu0 %v3978_v17  ;;  %v3583_v17 = vcombine.low %v1811_v7, %v1815_v8  ;;  %v4093_v7 = vld [vmem:[#allocation5 + $0x110] ss:$12 sps:$4 sm:$0xff]  }
  0xda   :  { %1512 = vmatprep.subr.bf16.mxu0 %v3983_v19  ;;  %2956 = vmatpush1.bf16.msra.mxu1 %v3575_v10  ;;  %v4011_v19 = vld [vmem:[#allocation5 + $0x4b0] ss:$12 sps:$4 sm:$0xff]   ;;  %v4099_v10 = vld [vmem:[#allocation5 + $0x68] ss:$12 sps:$4 sm:$0xff]  }
  0xdb   :  { %2957 = vmatprep.subr.bf16.mxu1 %v3584_v11  ;;  %v4095_v8 = vld [vmem:[#allocation5 + $0x50] ss:$12 sps:$4 sm:$0xff]   ;;  %v4101_v11 = vld [vmem:[#allocation5 + $0x140] ss:$12 sps:$4 sm:$0xff]  }
  0xdd   :  { %1513 = vmatpush1.bf16.msra.mxu0 %v3981_v23  ;;  %v3600_v23 = vcombine.high %v1827_v20, %v1831_v21 }
  0xde   :  { %1514 = vmatprep.subr.bf16.mxu0 %v3986_v27  ;;  %2958 = vmatpush1.bf16.msra.mxu1 %v3583_v17  ;;  %v3599_v27 = vcombine.low %v1827_v20, %v1831_v21  ;;  %v4111_v17 = vld [vmem:[#allocation5 + $0xb0] ss:$12 sps:$4 sm:$0xff]  }
  0xdf   :  { %2959 = vmatprep.subr.bf16.mxu1 %v3592_v18  ;;  %v1761_v20 = vld [vmem:[#allocation7 + $0x70] sm:$0xff] }
  0xe1   :  { %1515 = vmatpush1.bf16.msra.mxu0 %v3984_v31  ;;  %v1843_v31 = vld [vmem:[#allocation7 + $0x300] sm:$0xff] }
  0xe2   :  { %1516 = vmatprep.subr.bf16.mxu0 %v3989_v34  ;;  %v3607_v34 = vcombine.low %v1835_v24, %v1839_v25  ;;  %v3616_v35 = vcombine.high %v1843_v31, %v1847_v32  ;;  %v1773_v25 = vld [vmem:[#allocation7 + $0xd0] sm:$0xff] }
  0xe5   :  { %1517 = vmatpush1.bf16.msra.mxu0 %v3987_v37  ;;  %v1851_v37 = vld [vmem:[#allocation7 + $0x340] sm:$0xff] }
  0xe6   :  { %1518 = vmatprep.subr.bf16.mxu0 %v3992_v41  ;;  %v3615_v41 = vcombine.low %v1843_v31, %v1847_v32  ;;  %v3624_v42 = vcombine.high %v1851_v37, %v1855_v38  ;;  %v3623_v45 = vcombine.low %v1851_v37, %v1855_v38  ;;  %v1785_v31 = vld [vmem:[#allocation7 + $0x130] sm:$0xff] }
  0xe7   :  { %v1797_v37 = vld [vmem:[#allocation7 + $0x190] sm:$0xff] }
  0xe8   :  { %v1801_v38 = vld [vmem:[#allocation7 + $0x1b0] sm:$0xff] }
  0xe9   :  { %1519 = vmatpush1.bf16.msra.mxu0 %v3990_v44  ;;  %v4038_v44 = vld [vmem:[#allocation5 + $0x52c] ss:$12 sps:$4 sm:$0xff]  }
  0xea   :  { %1520 = vmatprep.subr.bf16.mxu0 %v3995_v47  ;;  %v4043_v47 = vld [vmem:[#allocation5 + $0x544] ss:$12 sps:$4 sm:$0xff]  }
  0xed   :  { %1521 = vmatpush1.bf16.msra.mxu0 %v3993_v50  ;;  %v4046_v50 = vld [vmem:[#allocation5 + $0x558] ss:$12 sps:$4 sm:$0xff]  }
  0xee   :  { %1522 = vmatprep.subr.bf16.mxu0 %v3998_v53  ;;  %v4058_v53 = vld [vmem:[#allocation5 + $0x58c] ss:$12 sps:$4 sm:$0xff]  }
  0xf1   :  { %1523 = vmatpush1.bf16.msra.mxu0 %v3996_v58  ;;  %v4061_v58 = vld [vmem:[#allocation5 + $0x5a0] ss:$12 sps:$4 sm:$0xff]  }
  0xf2   :  { %1524 = vmatprep.subr.bf16.mxu0 %v4001_v61  ;;  %v4073_v61 = vld [vmem:[#allocation5 + $0x5d4] ss:$12 sps:$4 sm:$0xff]  }
  0xf5   :  { %1525 = vmatpush1.bf16.msra.mxu0 %v3999_v0  ;;  %v4076_v0 = vld [vmem:[#allocation5 + $0x5e8] ss:$12 sps:$4 sm:$0xff]  }
  0xf6   :  { %1537 = vmatprep.subr.bf16.mxu0 %v4004_v1  ;;  %v4081_v1 = vld [vmem:[#allocation5 + $0xc8] ss:$12 sps:$4 sm:$0xff]  }
  0xf8   :  { %1527 = vmatmul.mubr.bf16.vlgmr.msra.gmra.mrb[0].mxu0 %v4311_v54  ;;  %v3591_v54 = vcombine.low %v1819_v13, %v1823_v14  ;;  %v4109_v13 = vld [vmem:[#allocation5 + $0x170] ss:$12 sps:$4 sm:$0xff]  }
  0xf9   :  { %1538 = vmatpush1.bf16.msra.mxu0 %v4002_v6  ;;  %1569 = vmatprep.mubr.bf16.mxu0 %v4315_v56  ;;  %v4016_v56 = vld [vmem:[#allocation5 + $0x4c8] ss:$12 sps:$4 sm:$0xff]   ;;  %v4091_v6 = vld [vmem:[#allocation5 + $0x38] ss:$12 sps:$4 sm:$0xff]  }
  0xfa   :  { %1539 = vmatprep.subr.bf16.mxu0 %v4008_v9  ;;  %2960 = vmatpush1.bf16.msra.mxu1 %v3591_v54  ;;  %v4097_v9 = vld [vmem:[#allocation5 + $0x128] ss:$12 sps:$4 sm:$0xff]  }
  0xfb   :  { %2961 = vmatprep.subr.bf16.mxu1 %v3600_v23  ;;  %v1749_v14 = vld [vmem:[#allocation7 + $0x10] sm:$0xff] }
  0xfc   :  { %v1765_v54 = vld [vmem:[#allocation7 + $0x90] sm:$0xff] }
  0xfd   :  { %1540 = vmatpush1.bf16.msra.mxu0 %v4006_v12  ;;  %v4105_v12 = vld [vmem:[#allocation5 + $0x158] ss:$12 sps:$4 sm:$0xff]   ;;  %v1769_v23 = vld [vmem:[#allocation7 + $0xb0] sm:$0xff] }
  0xfe   :  { %1541 = vmatprep.subr.bf16.mxu0 %v4013_v16  ;;  %2962 = vmatpush1.bf16.msra.mxu1 %v3599_v27  ;;  %v1753_v16 = vld [vmem:[#allocation7 + $0x30] sm:$0xff]  ;;  %v3540_v24 = vcombine.high %v1765_v54, %v1769_v23  ;;  %v3539_v27 = vcombine.low %v1765_v54, %v1769_v23  ;;  %v1871_v54 = vld [vmem:[#allocation7 + $0x3e0] sm:$0xff] }
  0xff   :  { %2963 = vmatprep.subr.bf16.mxu1 %v3608_v28  ;;  %v3524_v18 = vcombine.high %v1749_v14, %v1753_v16  ;;  %v3523_v21 = vcombine.low %v1749_v14, %v1753_v16  ;;  %v1863_v14 = vld [vmem:[#allocation7 + $0x3a0] sm:$0xff]  ;;  %v1861_v16 = vld [vmem:[#allocation7 + $0x390] sm:$0xff] }
 0x100   :  { %v1869_v23 = vld [vmem:[#allocation7 + $0x3d0] sm:$0xff] }
 0x101   :  { %1542 = vmatpush1.bf16.msra.mxu0 %v4011_v19  ;;  %v1757_v19 = vld [vmem:[#allocation7 + $0x50] sm:$0xff] }
 0x102   :  { %1543 = vmatprep.subr.bf16.mxu0 %v4018_v22  ;;  %2964 = vmatpush1.bf16.msra.mxu1 %v3607_v34  ;;  %v3532_v22 = vcombine.high %v1757_v19, %v1761_v20  ;;  %v1789_v34 = vld [vmem:[#allocation7 + $0x150] sm:$0xff] }
 0x103   :  { %2965 = vmatprep.subr.bf16.mxu1 %v3616_v35  ;;  %v1793_v35 = vld [vmem:[#allocation7 + $0x170] sm:$0xff] }
 0x105   :  { %1544 = vmatpush1.bf16.msra.mxu0 %v4016_v56  ;;  %v3531_v56 = vcombine.low %v1757_v19, %v1761_v20 }
 0x106   :  { %1545 = vmatprep.subr.bf16.mxu0 %v4023_v26  ;;  %2966 = vmatpush1.bf16.msra.mxu1 %v3615_v41  ;;  %v1777_v26 = vld [vmem:[#allocation7 + $0xf0] sm:$0xff]  ;;  %v3572_v41 = vcombine.high %v1797_v37, %v1801_v38 }
 0x107   :  { %2967 = vmatprep.subr.bf16.mxu1 %v3624_v42  ;;  %v3548_v28 = vcombine.high %v1773_v25, %v1777_v26  ;;  %v3547_v32 = vcombine.low %v1773_v25, %v1777_v26  ;;  %v1805_v42 = vld [vmem:[#allocation7 + $0x1d0] sm:$0xff] }
 0x109   :  { %1546 = vmatpush1.bf16.msra.mxu0 %v4021_v30  ;;  %v1781_v30 = vld [vmem:[#allocation7 + $0x110] sm:$0xff] }
 0x10a   :  { %1547 = vmatprep.subr.bf16.mxu0 %v4028_v33  ;;  %2968 = vmatpush1.bf16.msra.mxu1 %v3623_v45  ;;  %v3556_v33 = vcombine.high %v1781_v30, %v1785_v31 }
 0x10d   :  { %1548 = vmatpush1.bf16.msra.mxu0 %v4026_v36  ;;  %v3564_v36 = vcombine.high %v1789_v34, %v1793_v35 }
 0x10e   :  { %1549 = vmatprep.subr.bf16.mxu0 %v4033_v40  ;;  %v3563_v40 = vcombine.low %v1789_v34, %v1793_v35  ;;  %v1875_v35 = vld [vmem:[#allocation7 + $0x400] sm:$0xff] }
 0x111   :  { %1550 = vmatpush1.bf16.msra.mxu0 %v4031_v43  ;;  %v1809_v43 = vld [vmem:[#allocation7 + $0x1f0] sm:$0xff] }
 0x112   :  { %1551 = vmatprep.subr.bf16.mxu0 %v4038_v44  ;;  %v3571_v44 = vcombine.low %v1797_v37, %v1801_v38  ;;  %v3580_v45 = vcombine.high %v1805_v42, %v1809_v43  ;;  %v1877_v38 = vld [vmem:[#allocation7 + $0x410] sm:$0xff] }
 0x115   :  { %1552 = vmatpush1.bf16.msra.mxu0 %v4036_v46  ;;  %v1813_v46 = vld [vmem:[#allocation7 + $0x210] sm:$0xff] }
 0x116   :  { %1553 = vmatprep.subr.bf16.mxu0 %v4043_v47  ;;  %v1817_v47 = vld [vmem:[#allocation7 + $0x230] sm:$0xff] }
 0x119   :  { %1554 = vmatpush1.bf16.msra.mxu0 %v4041_v48 }
 0x11a   :  { %1555 = vmatprep.subr.bf16.mxu0 %v4048_v49 }
 0x11d   :  { %1556 = vmatpush1.bf16.msra.mxu0 %v4046_v50  ;;  %v3579_v50 = vcombine.low %v1805_v42, %v1809_v43 }
 0x11e   :  { %1557 = vmatprep.subr.bf16.mxu0 %v4053_v51 }
 0x121   :  { %1558 = vmatpush1.bf16.msra.mxu0 %v4051_v52 }
 0x122   :  { %1559 = vmatprep.subr.bf16.mxu0 %v4058_v53  ;;  %v3588_v53 = vcombine.high %v1813_v46, %v1817_v47 }
 0x125   :  { %1560 = vmatpush1.bf16.msra.mxu0 %v4056_v55 }
 0x126   :  { %1561 = vmatprep.subr.bf16.mxu0 %v4063_v57  ;;  %v1821_v57 = vld [vmem:[#allocation7 + $0x250] sm:$0xff] }
 0x129   :  { %1562 = vmatpush1.bf16.msra.mxu0 %v4061_v58  ;;  %v1825_v58 = vld [vmem:[#allocation7 + $0x270] sm:$0xff] }
 0x12a   :  { %1563 = vmatprep.subr.bf16.mxu0 %v4068_v59 }
 0x12d   :  { %1564 = vmatpush1.bf16.msra.mxu0 %v4066_v60  ;;  %v3587_v60 = vcombine.low %v1813_v46, %v1817_v47 }
 0x12e   :  { %1565 = vmatprep.subr.bf16.mxu0 %v4073_v61  ;;  %v3596_v61 = vcombine.high %v1821_v57, %v1825_v58 }
 0x131   :  { %1566 = vmatpush1.bf16.msra.mxu0 %v4071_v62  ;;  %v1829_v62 = vld [vmem:[#allocation7 + $0x290] sm:$0xff] }
 0x132   :  { %1567 = vmatprep.subr.bf16.mxu0 %v4078_v63  ;;  %v1833_v63 = vld [vmem:[#allocation7 + $0x2b0] sm:$0xff] }
 0x135   :  { %1568 = vmatpush1.bf16.msra.mxu0 %v4076_v0  ;;  %v3595_v0 = vcombine.low %v1821_v57, %v1825_v58 }
 0x136   :  { %3711 = vmatprep.subr.bf16.mxu0 %v4081_v1  ;;  %v3604_v1 = vcombine.high %v1829_v62, %v1833_v63 }
 0x138   :  { %1570 = vmatmul.mubr.bf16.vlgmr.msra.gmra.mrb[0].mxu0 %v4321_v29  ;;  %v4103_v29 = vld [vmem:[#allocation5 + $0x80] ss:$12 sps:$4 sm:$0xff]  }
 0x139   :  { %3712 = vmatpush3.bf16.msra.mxu0 %v4083_v2  ;;  %1612 = vmatprep.mubr.bf16.mxu0 %v4285_v15  ;;  %v4107_v15 = vld [vmem:[#allocation5 + $0x98] ss:$12 sps:$4 sm:$0xff]   ;;  %v1837_v2 = vld [vmem:[#allocation7 + $0x2d0] sm:$0xff] }
 0x13a   :  { %3713 = vmatprep.subr.bf16.mxu0 %v4085_v3  ;;  %v3749_v48 = vpop.f32.mrb[0].mxu1  ;;  %v1841_v3 = vld [vmem:[#allocation7 + $0x2f0] sm:$0xff] }
 0x13b   :  { %v3750_v49 = vpop.f32.mrb[1].mxu1 }
 0x13c   :  { %v4329_v51 = vadd.f32 %v3750_v49, %v3749_v48  ;;  %v3752_v52 = vpop.f32.mrb[2].mxu1  ;;  %v329_v49 = vlaneseq }
 0x13d   :  { %3714 = vmatpush3.bf16.msra.mxu0 %v4087_v4  ;;  %v3753_v55 = vpop.f32.mrb[3].mxu1  ;;  %v3603_v4 = vcombine.low %v1829_v62, %v1833_v63 }
 0x13e   :  { %3715 = vmatprep.subr.bf16.mxu0 %v4089_v5  ;;  %v4331_v59 = vadd.f32 %v3753_v55, %v3752_v52  ;;  %v3612_v5 = vcombine.high %v1837_v2, %v1841_v3 }
 0x141   :  { %3716 = vmatpush3.bf16.msra.mxu0 %v4091_v6  ;;  %v1845_v6 = vld [vmem:[#allocation7 + $0x310] sm:$0xff] }
 0x142   :  { %3717 = vmatprep.subr.bf16.mxu0 %v4093_v7  ;;  %v1849_v7 = vld [vmem:[#allocation7 + $0x330] sm:$0xff] }
 0x145   :  { %3718 = vmatpush3.bf16.msra.mxu0 %v4095_v8  ;;  %v3611_v8 = vcombine.low %v1837_v2, %v1841_v3  ;;  %v1883_v2 = vld [vmem:[#allocation7 + $0x440] sm:$0xff] }
 0x146   :  { %3719 = vmatprep.subr.bf16.mxu0 %v4097_v9  ;;  %v3620_v9 = vcombine.high %v1845_v6, %v1849_v7 }
 0x149   :  { %3720 = vmatpush3.bf16.msra.mxu0 %v4099_v10  ;;  %v1853_v10 = vld [vmem:[#allocation7 + $0x350] sm:$0xff] }
 0x14a   :  { %3721 = vmatprep.subr.bf16.mxu0 %v4101_v11  ;;  %v1857_v11 = vld [vmem:[#allocation7 + $0x370] sm:$0xff] }
 0x14d   :  { %3722 = vmatpush3.bf16.msra.mxu0 %v4103_v29  ;;  %v3619_v29 = vcombine.low %v1845_v6, %v1849_v7  ;;  %v1885_v6 = vld [vmem:[#allocation7 + $0x450] sm:$0xff] }
 0x14e   :  { %3723 = vmatprep.subr.bf16.mxu0 %v4105_v12  ;;  %v3628_v12 = vcombine.high %v1853_v10, %v1857_v11  ;;  %v1889_v7 = vld [vmem:[#allocation7 + $0x470] sm:$0xff] }
 0x151   :  { %3724 = vmatpush3.bf16.msra.mxu0 %v4107_v15  ;;  %v3627_v15 = vcombine.low %v1853_v10, %v1857_v11  ;;  %v3660_v11 = vcombine.high %v1885_v6, %v1889_v7 }
 0x152   :  { %3725 = vmatprep.subr.bf16.mxu0 %v4109_v13  ;;  %v1859_v13 = vld [vmem:[#allocation7 + $0x380] sm:$0xff] }
 0x153   :  { %v3631_v19 = vcombine.low %v1859_v13, %v1863_v14 }
 0x155   :  { %3726 = vmatpush3.bf16.msra.mxu0 %v4111_v17  ;;  %v3632_v17 = vcombine.high %v1859_v13, %v1863_v14  ;;  %v1897_v13 = vld [vmem:[#allocation7 + $0x4b0] sm:$0xff] }
 0x156   :  { %3113 = vmatprep.subr.bf16.mxu0 %v3524_v18  ;;  %v1865_v18 = vld [vmem:[#allocation7 + $0x3b0] sm:$0xff] }
 0x157   :  { %v3636_v20 = vcombine.high %v1861_v16, %v1865_v18  ;;  %2969 = vmatprep.subr.bf16.mxu1 %v3632_v17 }
 0x158   :  { %1613 = vmatmul.mubr.bf16.vlgmr.msra.gmra.mrb[4].mxu0 %v4294_v39  ;;  %v3555_v39 = vcombine.low %v1781_v30, %v1785_v31  ;;  %2970 = vmatpush1.bf16.msra.mxu1 %v3631_v19  ;;  %v1899_v19 = vld [vmem:[#allocation7 + $0x4c0] sm:$0xff] }
 0x159   :  { %3114 = vmatpush1.bf16.msra.mxu0 %v3523_v21  ;;  %v3635_v21 = vcombine.low %v1861_v16, %v1865_v18  ;;  %v3659_v16 = vcombine.low %v1885_v6, %v1889_v7 }
 0x15a   :  { %3115 = vmatprep.subr.bf16.mxu0 %v3532_v22  ;;  %v1867_v22 = vld [vmem:[#allocation7 + $0x3c0] sm:$0xff] }
 0x15b   :  { %v3639_v25 = vcombine.low %v1867_v22, %v1871_v54 }
 0x15d   :  { %3116 = vmatpush1.bf16.msra.mxu0 %v3531_v56  ;;  %v3640_v56 = vcombine.high %v1867_v22, %v1871_v54  ;;  %v1905_v22 = vld [vmem:[#allocation7 + $0x4f0] sm:$0xff]  ;;  %v4215_v54 = vmov 0  }
 0x15e   :  { %3117 = vmatprep.subr.bf16.mxu0 %v3540_v24  ;;  %v1873_v24 = vld [vmem:[#allocation7 + $0x3f0] sm:$0xff] }
 0x15f   :  { %v3644_v26 = vcombine.high %v1869_v23, %v1873_v24  ;;  %2971 = vmatprep.subr.bf16.mxu1 %v3640_v56  ;;  %v3643_v30 = vcombine.low %v1869_v23, %v1873_v24 }
 0x160   :  { %2972 = vmatpush1.bf16.msra.mxu1 %v3639_v25 }
 0x161   :  { %3118 = vmatpush1.bf16.msra.mxu0 %v3539_v27  ;;  %v3771_v27 = vpop.f32.mrb[4].mxu1 }
 0x162   :  { %3119 = vmatprep.subr.bf16.mxu0 %v3548_v28  ;;  %v3772_v28 = vpop.f32.mrb[5].mxu1 }
 0x163   :  { %v4333_v31 = vadd.f32 %v3772_v28, %v3771_v27  ;;  %v1911_v27 = vld [vmem:[#allocation7 + $0x520] sm:$0xff]  ;;  %v1909_v28 = vld [vmem:[#allocation7 + $0x510] sm:$0xff] }
 0x165   :  { %3120 = vmatpush1.bf16.msra.mxu0 %v3547_v32  ;;  %v3774_v32 = vpop.f32.mrb[6].mxu1 }
 0x166   :  { %3121 = vmatprep.subr.bf16.mxu0 %v3556_v33  ;;  %v3775_v33 = vpop.f32.mrb[7].mxu1 }
 0x167   :  { %v4335_v34 = vadd.f32 %v3775_v33, %v3774_v32 }
 0x169   :  { %3122 = vmatpush1.bf16.msra.mxu0 %v3555_v39  ;;  %v1879_v39 = vld [vmem:[#allocation7 + $0x420] sm:$0xff] }
 0x16a   :  { %3123 = vmatprep.subr.bf16.mxu0 %v3564_v36  ;;  %v3647_v36 = vcombine.low %v1875_v35, %v1879_v39  ;;  %v3648_v37 = vcombine.high %v1875_v35, %v1879_v39 }
 0x16c   :  { %2984 = vmatprep.subr.bf16.mxu1 %v3648_v37  ;;  %v1919_v37 = vld [vmem:[#allocation7 + $0x560] sm:$0xff] }
 0x16d   :  { %3124 = vmatpush1.bf16.msra.mxu0 %v3563_v40  ;;  %v1881_v40 = vld [vmem:[#allocation7 + $0x430] sm:$0xff] }
 0x16e   :  { %3125 = vmatprep.subr.bf16.mxu0 %v3572_v41  ;;  %v3651_v41 = vcombine.low %v1877_v38, %v1881_v40  ;;  %v3652_v42 = vcombine.high %v1877_v38, %v1881_v40  ;;  %v1917_v38 = vld [vmem:[#allocation7 + $0x550] sm:$0xff] }
 0x16f   :  { %v1921_v40 = vld [vmem:[#allocation7 + $0x570] sm:$0xff] }
 0x171   :  { %3126 = vmatpush1.bf16.msra.mxu0 %v3571_v44 }
 0x172   :  { %3127 = vmatprep.subr.bf16.mxu0 %v3580_v45 }
 0x175   :  { %3128 = vmatpush1.bf16.msra.mxu0 %v3579_v50  ;;  %v4341_v50 = vshrl.u32 %v329_v49, 7  ;;  %v1925_v49 = vld [vmem:[#allocation7 + $0x590] sm:$0xff] }
 0x176   :  { %3129 = vmatprep.subr.bf16.mxu0 %v3588_v53  ;;  %v4347_v53 = vld [vmem:[%s4416_s2] sm:$0x7] }
 0x177   :  { %v331_v52 = vsub.s32 0, %v4341_v50  ;;  %v335_v55 = vsub.s32 1, %v4341_v50 }
 0x179   :  { %3130 = vmatpush1.bf16.msra.mxu0 %v3587_v60  ;;  %v332_v57 = vrot.slane %v4347_v53, %v331_v52  ;;  %v336_v60 = vrot.slane %v4347_v53, %v335_v55 }
 0x17a   :  { %3131 = vmatprep.subr.bf16.mxu0 %v3596_v61 }
 0x17d   :  { %3132 = vmatpush1.bf16.msra.mxu0 %v3595_v0 }
 0x17e   :  { %3133 = vmatprep.subr.bf16.mxu0 %v3604_v1 }
 0x181   :  { %3134 = vmatpush1.bf16.msra.mxu0 %v3603_v4 }
 0x182   :  { %3135 = vmatprep.subr.bf16.mxu0 %v3612_v5  ;;  %v1887_v5 = vld [vmem:[#allocation7 + $0x460] sm:$0xff] }
 0x183   :  { %v3656_v10 = vcombine.high %v1883_v2, %v1887_v5  ;;  %v3655_v14 = vcombine.low %v1883_v2, %v1887_v5  ;;  %v1933_v2 = vld [vmem:[#allocation7 + $0x5d0] sm:$0xff] }
 0x185   :  { %3136 = vmatpush1.bf16.msra.mxu0 %v3611_v8 }
 0x186   :  { %3137 = vmatprep.subr.bf16.mxu0 %v3620_v9 }
 0x189   :  { %3138 = vmatpush1.bf16.msra.mxu0 %v3619_v29  ;;  %v1891_v29 = vld [vmem:[#allocation7 + $0x480] sm:$0xff] }
 0x18a   :  { %3139 = vmatprep.subr.bf16.mxu0 %v3628_v12  ;;  %v1895_v12 = vld [vmem:[#allocation7 + $0x4a0] sm:$0xff] }
 0x18b   :  { %v3664_v17 = vcombine.high %v1891_v29, %v1895_v12  ;;  %v3663_v23 = vcombine.low %v1891_v29, %v1895_v12  ;;  %v1748_v29 = vld [vmem:[#allocation7 + $0x8] sm:$0xff] }
 0x18c   :  { %v1752_v12 = vld [vmem:[#allocation7 + $0x28] sm:$0xff] }
 0x18d   :  { %3140 = vmatpush1.bf16.msra.mxu0 %v3627_v15  ;;  %v1893_v15 = vld [vmem:[#allocation7 + $0x490] sm:$0xff] }
 0x18e   :  { %3141 = vmatprep.subr.bf16.mxu0 %v3636_v20  ;;  %v3668_v18 = vcombine.high %v1893_v15, %v1897_v13  ;;  %v1903_v20 = vld [vmem:[#allocation7 + $0x4e0] sm:$0xff]  ;;  %v3667_v56 = vcombine.low %v1893_v15, %v1897_v13 }
 0x18f   :  { %v3672_v24 = vcombine.high %v1899_v19, %v1903_v20  ;;  %v3671_v32 = vcombine.low %v1899_v19, %v1903_v20  ;;  %v3522_v19 = vcombine.high %v1748_v29, %v1752_v12 }
 0x190   :  { %v3793_v43 = vpop.f32.mrb[8].mxu1 }
 0x191   :  { %3142 = vmatpush1.bf16.msra.mxu0 %v3635_v21  ;;  %v3794_v44 = vpop.f32.mrb[9].mxu1  ;;  %v1901_v21 = vld [vmem:[#allocation7 + $0x4d0] sm:$0xff] }
 0x192   :  { %3143 = vmatprep.subr.bf16.mxu0 %v3644_v26  ;;  %v4337_v45 = vadd.f32 %v3794_v44, %v3793_v43  ;;  %v3796_v46 = vpop.f32.mrb[10].mxu1  ;;  %v3676_v25 = vcombine.high %v1901_v21, %v1905_v22  ;;  %v1907_v26 = vld [vmem:[#allocation7 + $0x500] sm:$0xff]  ;;  %v3675_v33 = vcombine.low %v1901_v21, %v1905_v22  ;;  %v3692_v44 = vcombine.high %v1917_v38, %v1921_v40 }
 0x193   :  { %v3797_v47 = vpop.f32.mrb[11].mxu1  ;;  %v3680_v35 = vcombine.high %v1907_v26, %v1911_v27 }
 0x194   :  { %v4339_v48 = vadd.f32 %v3797_v47, %v3796_v46  ;;  %v1923_v46 = vld [vmem:[#allocation7 + $0x580] sm:$0xff] }
 0x195   :  { %3144 = vmatpush1.bf16.msra.mxu0 %v3643_v30  ;;  %v1913_v30 = vld [vmem:[#allocation7 + $0x530] sm:$0xff]  ;;  %v1927_v47 = vld [vmem:[#allocation7 + $0x5a0] sm:$0xff] }
 0x196   :  { %3156 = vmatprep.subr.bf16.mxu0 %v3652_v42  ;;  %v3684_v39 = vcombine.high %v1909_v28, %v1913_v30  ;;  %v3683_v42 = vcombine.low %v1909_v28, %v1913_v30  ;;  %v3521_v30 = vcombine.low %v1748_v29, %v1752_v12 }
 0x20b   :  { %v1571_v58 = vpop.f32.mrb[0].mxu0 }
 0x20c   :  { %v1573_v61 = vpop.f32.mrb[1].mxu0  ;;  %v3799_v63 = vadd.f32 %v1571_v58, %v332_v57 }
 0x20d   :  { %v1575_v62 = vpop.f32.mrb[2].mxu0  ;;  %v3800_v3 = vadd.f32 %v1573_v61, %v336_v60  ;;  %v3696_v61 = vcombine.high %v1923_v46, %v1927_v47 }
 0x20e   :  { %v3801_v0 = vadd.f32 %v1575_v62, %v332_v57  ;;  %v1577_v1 = vpop.f32.mrb[3].mxu0  ;;  %v1929_v57 = vld [vmem:[#allocation7 + $0x5b0] sm:$0xff] }
 0x20f   :  { %v3802_v4 = vadd.f32 %v1577_v1, %v336_v60  ;;  %v3691_v60 = vcombine.low %v1917_v38, %v1921_v40  ;;  %v3700_v62 = vcombine.high %v1925_v49, %v1929_v57  ;;  %v1935_v1 = vld [vmem:[#allocation7 + $0x5e0] sm:$0xff]  ;;  %v3699_v5 = vcombine.low %v1925_v49, %v1929_v57 }
 0x210   :  { %v4356_v8 = vpack.c.bf16 %v3801_v0, %v3799_v63  ;;  %v1931_v63 = vld [vmem:[#allocation7 + $0x5c0] sm:$0xff]  ;;  %v339_v0 = vsub.s32 2, %v4341_v50 }
 0x211   :  { %v4358_v9 = vpack.c.bf16 %v3802_v4, %v3800_v3  ;;  %v1937_v3 = vld [vmem:[#allocation7 + $0x5f0] sm:$0xff]  ;;  %v3695_v4 = vcombine.low %v1923_v46, %v1927_v47  ;;  %v3704_v6 = vcombine.high %v1931_v63, %v1935_v1  ;;  %v1796_v46 = vld [vmem:[#allocation7 + $0x188] sm:$0xff] }
 0x212   :  { %v3708_v7 = vcombine.high %v1933_v2, %v1937_v3  ;;  %v1800_v47 = vld [vmem:[#allocation7 + $0x1a8] sm:$0xff] }
 0x213   :  { %2973 = vmatprep.mubr.bf16.mxu1 %v4358_v9  ;;  %3145 = vmatprep.mubr.bf16.mxu0 %v4358_v9  ;;  %v3570_v57 = vcombine.high %v1796_v46, %v1800_v47 }
 0x214   :  { %2974 = vmatmul.mubr.bf16.vlgmr.msra.gmra.mrb[12].mxu1 %v4356_v8  ;;  %3146 = vmatmul.mubr.bf16.vlgmr.msra.gmra.mrb[8].mxu0 %v4356_v8 }
 0x215   :  { %2985 = vmatpush1.bf16.msra.mxu1 %v3647_v36  ;;  %3157 = vmatpush1.bf16.msra.mxu0 %v3651_v41  ;;  %v1915_v36 = vld [vmem:[#allocation7 + $0x540] sm:$0xff]  ;;  %v3679_v41 = vcombine.low %v1907_v26, %v1911_v27  ;;  %v1756_v26 = vld [vmem:[#allocation7 + $0x48] sm:$0xff] }
 0x216   :  { %2986 = vmatprep.subr.bf16.mxu1 %v3656_v10  ;;  %3158 = vmatprep.subr.bf16.mxu0 %v3660_v11  ;;  %v3688_v43 = vcombine.high %v1915_v36, %v1919_v37  ;;  %v3687_v58 = vcombine.low %v1915_v36, %v1919_v37  ;;  %v340_v11 = vrot.slane %v4347_v53, %v339_v0  ;;  %v1760_v27 = vld [vmem:[#allocation7 + $0x68] sm:$0xff] }
 0x217   :  { %3016 = vmatprep.mubr.bf16.mxu1 %v4215_v54  ;;  %3188 = vmatprep.mubr.bf16.mxu0 %v4215_v54  ;;  %v1780_v36 = vld [vmem:[#allocation7 + $0x108] sm:$0xff] }
 0x218   :  { %v1784_v37 = vld [vmem:[#allocation7 + $0x128] sm:$0xff] }
 0x219   :  { %2987 = vmatpush1.bf16.msra.mxu1 %v3655_v14  ;;  %3159 = vmatpush1.bf16.msra.mxu0 %v3659_v16  ;;  %v3703_v16 = vcombine.low %v1931_v63, %v1935_v1  ;;  %v3554_v40 = vcombine.high %v1780_v36, %v1784_v37  ;;  %v1812_v63 = vld [vmem:[#allocation7 + $0x208] sm:$0xff] }
 0x21a   :  { %2988 = vmatprep.subr.bf16.mxu1 %v3664_v17  ;;  %3160 = vmatprep.subr.bf16.mxu0 %v3668_v18  ;;  %v3707_v17 = vcombine.low %v1933_v2, %v1937_v3  ;;  %v1816_v1 = vld [vmem:[#allocation7 + $0x228] sm:$0xff] }
 0x21b   :  { %v3586_v3 = vcombine.high %v1812_v63, %v1816_v1 }
 0x21d   :  { %2989 = vmatpush1.bf16.msra.mxu1 %v3663_v23  ;;  %3161 = vmatpush1.bf16.msra.mxu0 %v3667_v56 }
 0x21e   :  { %2990 = vmatprep.subr.bf16.mxu1 %v3672_v24  ;;  %3162 = vmatprep.subr.bf16.mxu0 %v3676_v25 }
 0x221   :  { %2991 = vmatpush1.bf16.msra.mxu1 %v3671_v32  ;;  %3163 = vmatpush1.bf16.msra.mxu0 %v3675_v33  ;;  %v1764_v33 = vld [vmem:[#allocation7 + $0x88] sm:$0xff] }
 0x222   :  { %2992 = vmatprep.subr.bf16.mxu1 %v3680_v35  ;;  %3164 = vmatprep.subr.bf16.mxu0 %v3684_v39  ;;  %v1768_v35 = vld [vmem:[#allocation7 + $0xa8] sm:$0xff] }
 0x225   :  { %2993 = vmatpush1.bf16.msra.mxu1 %v3679_v41  ;;  %3165 = vmatpush1.bf16.msra.mxu0 %v3683_v42  ;;  %v1788_v41 = vld [vmem:[#allocation7 + $0x148] sm:$0xff] }
 0x226   :  { %2994 = vmatprep.subr.bf16.mxu1 %v3688_v43  ;;  %3166 = vmatprep.subr.bf16.mxu0 %v3692_v44  ;;  %v1792_v42 = vld [vmem:[#allocation7 + $0x168] sm:$0xff]  ;;  %v3553_v43 = vcombine.low %v1780_v36, %v1784_v37 }
 0x227   :  { %v3562_v44 = vcombine.high %v1788_v41, %v1792_v42  ;;  %v3561_v49 = vcombine.low %v1788_v41, %v1792_v42  ;;  %v1892_v36 = vld [vmem:[#allocation7 + $0x488] sm:$0xff] }
 0x228   :  { %v1896_v37 = vld [vmem:[#allocation7 + $0x4a8] sm:$0xff] }
 0x229   :  { %2995 = vmatpush1.bf16.msra.mxu1 %v3687_v58  ;;  %3167 = vmatpush1.bf16.msra.mxu0 %v3691_v60  ;;  %v1804_v58 = vld [vmem:[#allocation7 + $0x1c8] sm:$0xff] }
 0x22a   :  { %2996 = vmatprep.subr.bf16.mxu1 %v3696_v61  ;;  %3168 = vmatprep.subr.bf16.mxu0 %v3700_v62  ;;  %v1808_v60 = vld [vmem:[#allocation7 + $0x1e8] sm:$0xff]  ;;  %v3569_v61 = vcombine.low %v1796_v46, %v1800_v47 }
 0x22b   :  { %v3727_v10 = vpop.f32.mrb[4].mxu0  ;;  %v3578_v62 = vcombine.high %v1804_v58, %v1808_v60  ;;  %v3577_v2 = vcombine.low %v1804_v58, %v1808_v60  ;;  %v1900_v41 = vld [vmem:[#allocation7 + $0x4c8] sm:$0xff] }
 0x22c   :  { %v3728_v15 = vpop.f32.mrb[5].mxu0  ;;  %v1904_v42 = vld [vmem:[#allocation7 + $0x4e8] sm:$0xff] }
 0x22d   :  { %v3729_v13 = vadd.f32 %v3728_v15, %v3727_v10  ;;  %v3730_v14 = vpop.f32.mrb[6].mxu0  ;;  %2997 = vmatpush1.bf16.msra.mxu1 %v3695_v4  ;;  %3169 = vmatpush1.bf16.msra.mxu0 %v3699_v5  ;;  %v1820_v4 = vld [vmem:[#allocation7 + $0x248] sm:$0xff] }
 0x22e   :  { %v3731_v18 = vpop.f32.mrb[7].mxu0  ;;  %2998 = vmatprep.subr.bf16.mxu1 %v3704_v6  ;;  %3170 = vmatprep.subr.bf16.mxu0 %v3708_v7  ;;  %v1824_v5 = vld [vmem:[#allocation7 + $0x268] sm:$0xff]  ;;  %v3585_v6 = vcombine.low %v1812_v63, %v1816_v1 }
 0x22f   :  { %v1615_v20 = vadd.f32 %v3729_v13, %v340_v11  ;;  %v3732_v21 = vadd.f32 %v3731_v18, %v3730_v14  ;;  %v3594_v7 = vcombine.high %v1820_v4, %v1824_v5  ;;  %v1828_v10 = vld [vmem:[#allocation7 + $0x288] sm:$0xff]  ;;  %v3593_v29 = vcombine.low %v1820_v4, %v1824_v5 }
 0x230   :  { %v1836_v15 = vld [vmem:[#allocation7 + $0x2c8] sm:$0xff] }
 0x231   :  { %v1656_v22 = vadd.f32 %v4329_v51, %v1615_v20  ;;  %v1618_v23 = vadd.f32 %v3732_v21, %v340_v11  ;;  %2999 = vmatpush1.bf16.msra.mxu1 %v3703_v16  ;;  %3171 = vmatpush1.bf16.msra.mxu0 %v3707_v17  ;;  %v3530_v51 = vcombine.high %v1756_v26, %v1760_v27  ;;  %v1832_v11 = vld [vmem:[#allocation7 + $0x2a8] sm:$0xff] }
 0x232   :  { %3027 = vmatprep.subr.bf16.mxu1 %v3522_v19  ;;  %v3602_v12 = vcombine.high %v1828_v10, %v1832_v11  ;;  %v1840_v13 = vld [vmem:[#allocation7 + $0x2e8] sm:$0xff]  ;;  %v3601_v14 = vcombine.low %v1828_v10, %v1832_v11  ;;  %v1750_v10 = vld [vmem:[#allocation7 + $0x18] sm:$0xff] }
 0x233   :  { %v1659_v53 = vadd.f32 %v4331_v59, %v1618_v23  ;;  %v1697_v56 = vadd.f32 %v4333_v31, %v1656_v22  ;;  %v3529_v59 = vcombine.low %v1756_v26, %v1760_v27  ;;  %v3538_v31 = vcombine.high %v1764_v33, %v1768_v35  ;;  %v1844_v17 = vld [vmem:[#allocation7 + $0x308] sm:$0xff]  ;;  %v1754_v11 = vld [vmem:[#allocation7 + $0x38] sm:$0xff] }
 0x234   :  { %v3610_v16 = vcombine.high %v1836_v15, %v1840_v13  ;;  %v1848_v18 = vld [vmem:[#allocation7 + $0x328] sm:$0xff]  ;;  %v3609_v19 = vcombine.low %v1836_v15, %v1840_v13  ;;  %v1758_v15 = vld [vmem:[#allocation7 + $0x58] sm:$0xff] }
 0x235   :  { %v1738_v24 = vadd.f32 %v4337_v45, %v1697_v56  ;;  %v1700_v25 = vadd.f32 %v4335_v34, %v1659_v53  ;;  %v1772_v34 = vld [vmem:[#allocation7 + $0xc8] sm:$0xff]  ;;  %v3618_v20 = vcombine.high %v1844_v17, %v1848_v18  ;;  %v3617_v23 = vcombine.low %v1844_v17, %v1848_v18  ;;  %v1762_v13 = vld [vmem:[#allocation7 + $0x78] sm:$0xff] }
 0x236   :  { %v1776_v45 = vld [vmem:[#allocation7 + $0xe8] sm:$0xff]  ;;  %v1766_v17 = vld [vmem:[#allocation7 + $0x98] sm:$0xff] }
 0x237   :  { %v1741_v28 = vadd.f32 %v4339_v48, %v1700_v25  ;;  %v3537_v48 = vcombine.low %v1764_v33, %v1768_v35  ;;  %v3546_v39 = vcombine.high %v1772_v34, %v1776_v45  ;;  %v3545_v38 = vcombine.low %v1772_v34, %v1776_v45  ;;  %v1852_v21 = vld [vmem:[#allocation7 + $0x348] sm:$0xff]  ;;  %v1770_v18 = vld [vmem:[#allocation7 + $0xb8] sm:$0xff] }
 0x238   :  { %v1856_v22 = vld [vmem:[#allocation7 + $0x368] sm:$0xff] }
 0x239   :  { %v4376_v32 = vpack.c.bf16 %v1741_v28, %v1738_v24  ;;  %v3626_v53 = vcombine.high %v1852_v21, %v1856_v22  ;;  %v1860_v56 = vld [vmem:[#allocation7 + $0x388] sm:$0xff]  ;;  %v3625_v25 = vcombine.low %v1852_v21, %v1856_v22  ;;  %v1774_v21 = vld [vmem:[#allocation7 + $0xd8] sm:$0xff] }
 0x23a   :  { %v1864_v24 = vld [vmem:[#allocation7 + $0x3a8] sm:$0xff]  ;;  %v1778_v22 = vld [vmem:[#allocation7 + $0xf8] sm:$0xff] }
 0x23b   :  { %3017 = vmatmul.mubr.bf16.vlgmr.msra.gmra.mrb[12].mxu1 %v4376_v32  ;;  %3189 = vmatmul.mubr.bf16.vlgmr.msra.gmra.mrb[8].mxu0 %v4376_v32  ;;  %v3634_v26 = vcombine.high %v1860_v56, %v1864_v24  ;;  %v1868_v27 = vld [vmem:[#allocation7 + $0x3c8] sm:$0xff] }
 0x23c   :  { %3028 = vmatpush1.bf16.msra.mxu1 %v3521_v30  ;;  %3059 = vmatprep.mubr.bf16.mxu1 %v4358_v9  ;;  %v1872_v28 = vld [vmem:[#allocation7 + $0x3e8] sm:$0xff]  ;;  %v3633_v30 = vcombine.low %v1860_v56, %v1864_v24  ;;  %v1782_v56 = vld [vmem:[#allocation7 + $0x118] sm:$0xff] }
 0x23d   :  { %3029 = vmatprep.subr.bf16.mxu1 %v3530_v51  ;;  %v3642_v51 = vcombine.high %v1868_v27, %v1872_v28  ;;  %v1876_v33 = vld [vmem:[#allocation7 + $0x408] sm:$0xff]  ;;  %v1786_v24 = vld [vmem:[#allocation7 + $0x138] sm:$0xff] }
 0x23e   :  { %v1880_v35 = vld [vmem:[#allocation7 + $0x428] sm:$0xff] }
 0x23f   :  { %v1884_v34 = vld [vmem:[#allocation7 + $0x448] sm:$0xff] }
 0x240   :  { %3030 = vmatpush1.bf16.msra.mxu1 %v3529_v59  ;;  %v3641_v59 = vcombine.low %v1868_v27, %v1872_v28  ;;  %v1888_v45 = vld [vmem:[#allocation7 + $0x468] sm:$0xff]  ;;  %v1790_v27 = vld [vmem:[#allocation7 + $0x158] sm:$0xff] }
 0x241   :  { %3031 = vmatprep.subr.bf16.mxu1 %v3538_v31  ;;  %v3650_v31 = vcombine.high %v1876_v33, %v1880_v35  ;;  %v1908_v46 = vld [vmem:[#allocation7 + $0x508] sm:$0xff]  ;;  %v1794_v28 = vld [vmem:[#allocation7 + $0x178] sm:$0xff] }
 0x242   :  { %v1912_v47 = vld [vmem:[#allocation7 + $0x528] sm:$0xff] }
 0x243   :  { %v1916_v58 = vld [vmem:[#allocation7 + $0x548] sm:$0xff] }
 0x244   :  { %3032 = vmatpush1.bf16.msra.mxu1 %v3537_v48  ;;  %v3649_v48 = vcombine.low %v1876_v33, %v1880_v35  ;;  %v1920_v60 = vld [vmem:[#allocation7 + $0x568] sm:$0xff]  ;;  %v1802_v33 = vld [vmem:[#allocation7 + $0x1b8] sm:$0xff]  ;;  %v3565_v35 = vcombine.low %v1790_v27, %v1794_v28 }
 0x245   :  { %3033 = vmatprep.subr.bf16.mxu1 %v3546_v39  ;;  %v3658_v39 = vcombine.high %v1884_v34, %v1888_v45  ;;  %v1924_v63 = vld [vmem:[#allocation7 + $0x588] sm:$0xff] }
 0x246   :  { %v1928_v1 = vld [vmem:[#allocation7 + $0x5a8] sm:$0xff] }
 0x247   :  { %v1932_v4 = vld [vmem:[#allocation7 + $0x5c8] sm:$0xff] }
 0x248   :  { %3034 = vmatpush1.bf16.msra.mxu1 %v3545_v38  ;;  %v3657_v38 = vcombine.low %v1884_v34, %v1888_v45  ;;  %v1936_v5 = vld [vmem:[#allocation7 + $0x5e8] sm:$0xff]  ;;  %v1810_v34 = vld [vmem:[#allocation7 + $0x1f8] sm:$0xff] }
 0x249   :  { %3035 = vmatprep.subr.bf16.mxu1 %v3554_v40  ;;  %v3666_v40 = vcombine.high %v1892_v36, %v1896_v37 }
 0x24c   :  { %3036 = vmatpush1.bf16.msra.mxu1 %v3553_v43  ;;  %v3665_v43 = vcombine.low %v1892_v36, %v1896_v37  ;;  %v1818_v36 = vld [vmem:[#allocation7 + $0x238] sm:$0xff] }
 0x24d   :  { %3037 = vmatprep.subr.bf16.mxu1 %v3562_v44  ;;  %v3674_v44 = vcombine.high %v1900_v41, %v1904_v42 }
 0x250   :  { %3038 = vmatpush1.bf16.msra.mxu1 %v3561_v49  ;;  %v3673_v49 = vcombine.low %v1900_v41, %v1904_v42  ;;  %v1826_v41 = vld [vmem:[#allocation7 + $0x278] sm:$0xff] }
 0x251   :  { %3039 = vmatprep.subr.bf16.mxu1 %v3570_v57  ;;  %v3682_v57 = vcombine.high %v1908_v46, %v1912_v47 }
 0x254   :  { %3040 = vmatpush1.bf16.msra.mxu1 %v3569_v61  ;;  %v3681_v61 = vcombine.low %v1908_v46, %v1912_v47  ;;  %v1834_v46 = vld [vmem:[#allocation7 + $0x2b8] sm:$0xff] }
 0x255   :  { %3041 = vmatprep.subr.bf16.mxu1 %v3578_v62  ;;  %v3690_v62 = vcombine.high %v1916_v58, %v1920_v60 }
 0x258   :  { %3042 = vmatpush1.bf16.msra.mxu1 %v3577_v2  ;;  %v3689_v2 = vcombine.low %v1916_v58, %v1920_v60  ;;  %v1842_v58 = vld [vmem:[#allocation7 + $0x2f8] sm:$0xff] }
 0x259   :  { %3043 = vmatprep.subr.bf16.mxu1 %v3586_v3  ;;  %v3698_v3 = vcombine.high %v1924_v63, %v1928_v1 }
 0x25c   :  { %3044 = vmatpush1.bf16.msra.mxu1 %v3585_v6  ;;  %v3697_v6 = vcombine.low %v1924_v63, %v1928_v1  ;;  %v1850_v63 = vld [vmem:[#allocation7 + $0x338] sm:$0xff] }
 0x25d   :  { %3045 = vmatprep.subr.bf16.mxu1 %v3594_v7  ;;  %v3706_v7 = vcombine.high %v1932_v4, %v1936_v5 }
 0x260   :  { %3046 = vmatpush1.bf16.msra.mxu1 %v3593_v29  ;;  %v3705_v29 = vcombine.low %v1932_v4, %v1936_v5  ;;  %v1858_v4 = vld [vmem:[#allocation7 + $0x378] sm:$0xff] }
 0x261   :  { %3047 = vmatprep.subr.bf16.mxu1 %v3602_v12  ;;  %v3526_v12 = vcombine.high %v1750_v10, %v1754_v11 }
 0x264   :  { %3048 = vmatpush1.bf16.msra.mxu1 %v3601_v14  ;;  %v3525_v14 = vcombine.low %v1750_v10, %v1754_v11  ;;  %v1866_v10 = vld [vmem:[#allocation7 + $0x3b8] sm:$0xff] }
 0x265   :  { %3049 = vmatprep.subr.bf16.mxu1 %v3610_v16  ;;  %v3534_v16 = vcombine.high %v1758_v15, %v1762_v13 }
 0x268   :  { %3050 = vmatpush1.bf16.msra.mxu1 %v3609_v19  ;;  %v3533_v19 = vcombine.low %v1758_v15, %v1762_v13  ;;  %v1874_v15 = vld [vmem:[#allocation7 + $0x3f8] sm:$0xff] }
 0x269   :  { %3051 = vmatprep.subr.bf16.mxu1 %v3618_v20  ;;  %v3542_v20 = vcombine.high %v1766_v17, %v1770_v18 }
 0x26c   :  { %3052 = vmatpush1.bf16.msra.mxu1 %v3617_v23  ;;  %v3541_v23 = vcombine.low %v1766_v17, %v1770_v18  ;;  %v1882_v17 = vld [vmem:[#allocation7 + $0x438] sm:$0xff] }
 0x26d   :  { %3053 = vmatprep.subr.bf16.mxu1 %v3626_v53  ;;  %v3550_v53 = vcombine.high %v1774_v21, %v1778_v22 }
 0x270   :  { %3054 = vmatpush1.bf16.msra.mxu1 %v3625_v25  ;;  %v3549_v25 = vcombine.low %v1774_v21, %v1778_v22  ;;  %v1890_v21 = vld [vmem:[#allocation7 + $0x478] sm:$0xff] }
 0x271   :  { %3055 = vmatprep.subr.bf16.mxu1 %v3634_v26  ;;  %v3558_v26 = vcombine.high %v1782_v56, %v1786_v24 }
 0x274   :  { %3056 = vmatpush1.bf16.msra.mxu1 %v3633_v30  ;;  %v3557_v30 = vcombine.low %v1782_v56, %v1786_v24  ;;  %v1898_v56 = vld [vmem:[#allocation7 + $0x4b8] sm:$0xff] }
 0x275   :  { %3057 = vmatprep.subr.bf16.mxu1 %v3642_v51  ;;  %v1798_v51 = vld [vmem:[#allocation7 + $0x198] sm:$0xff] }
 0x276   :  { %v3573_v45 = vcombine.low %v1798_v51, %v1802_v33 }
 0x278   :  { %3058 = vmatpush1.bf16.msra.mxu1 %v3641_v59  ;;  %v3574_v59 = vcombine.high %v1798_v51, %v1802_v33  ;;  %v1914_v51 = vld [vmem:[#allocation7 + $0x538] sm:$0xff] }
 0x279   :  { %3070 = vmatprep.subr.bf16.mxu1 %v3650_v31  ;;  %v1806_v31 = vld [vmem:[#allocation7 + $0x1d8] sm:$0xff] }
 0x27a   :  { %v3581_v37 = vcombine.low %v1806_v31, %v1810_v34 }
 0x27b   :  { %3060 = vmatmul.mubr.bf16.vlgmr.msra.gmra.mrb[16].mxu1 %v4356_v8 }
 0x27c   :  { %3071 = vmatpush1.bf16.msra.mxu1 %v3649_v48  ;;  %3102 = vmatprep.mubr.bf16.mxu1 %v4215_v54  ;;  %v3582_v48 = vcombine.high %v1806_v31, %v1810_v34  ;;  %v1926_v34 = vld [vmem:[#allocation7 + $0x598] sm:$0xff] }
 0x27d   :  { %3072 = vmatprep.subr.bf16.mxu1 %v3658_v39  ;;  %v1814_v39 = vld [vmem:[#allocation7 + $0x218] sm:$0xff] }
 0x27e   :  { %v3589_v42 = vcombine.low %v1814_v39, %v1818_v36 }
 0x280   :  { %3073 = vmatpush1.bf16.msra.mxu1 %v3657_v38  ;;  %v3590_v38 = vcombine.high %v1814_v39, %v1818_v36  ;;  %v1934_v36 = vld [vmem:[#allocation7 + $0x5d8] sm:$0xff] }
 0x281   :  { %3074 = vmatprep.subr.bf16.mxu1 %v3666_v40  ;;  %v1822_v40 = vld [vmem:[#allocation7 + $0x258] sm:$0xff] }
 0x282   :  { %v3597_v47 = vcombine.low %v1822_v40, %v1826_v41 }
 0x284   :  { %3075 = vmatpush1.bf16.msra.mxu1 %v3665_v43  ;;  %v3598_v43 = vcombine.high %v1822_v40, %v1826_v41 }
 0x285   :  { %3076 = vmatprep.subr.bf16.mxu1 %v3674_v44  ;;  %v1830_v44 = vld [vmem:[#allocation7 + $0x298] sm:$0xff] }
 0x286   :  { %v3605_v60 = vcombine.low %v1830_v44, %v1834_v46 }
 0x288   :  { %3077 = vmatpush1.bf16.msra.mxu1 %v3673_v49  ;;  %v3606_v49 = vcombine.high %v1830_v44, %v1834_v46  ;;  %v1963_v44 = vsub.s32 5, %v4341_v50 }
 0x289   :  { %3078 = vmatprep.subr.bf16.mxu1 %v3682_v57  ;;  %v1838_v57 = vld [vmem:[#allocation7 + $0x2d8] sm:$0xff] }
 0x28a   :  { %v3613_v1 = vcombine.low %v1838_v57, %v1842_v58 }
 0x28c   :  { %3079 = vmatpush1.bf16.msra.mxu1 %v3681_v61  ;;  %v3614_v61 = vcombine.high %v1838_v57, %v1842_v58 }
 0x28d   :  { %3080 = vmatprep.subr.bf16.mxu1 %v3690_v62  ;;  %v1846_v62 = vld [vmem:[#allocation7 + $0x318] sm:$0xff] }
 0x28e   :  { %v3621_v5 = vcombine.low %v1846_v62, %v1850_v63 }
 0x290   :  { %3081 = vmatpush1.bf16.msra.mxu1 %v3689_v2  ;;  %v3622_v2 = vcombine.high %v1846_v62, %v1850_v63 }
 0x291   :  { %3082 = vmatprep.subr.bf16.mxu1 %v3698_v3  ;;  %v1854_v3 = vld [vmem:[#allocation7 + $0x358] sm:$0xff] }
 0x292   :  { %v3629_v11 = vcombine.low %v1854_v3, %v1858_v4 }
 0x294   :  { %3083 = vmatpush1.bf16.msra.mxu1 %v3697_v6  ;;  %v3630_v6 = vcombine.high %v1854_v3, %v1858_v4 }
 0x295   :  { %3084 = vmatprep.subr.bf16.mxu1 %v3706_v7  ;;  %v1862_v7 = vld [vmem:[#allocation7 + $0x398] sm:$0xff] }
 0x296   :  { %v3637_v13 = vcombine.low %v1862_v7, %v1866_v10 }
 0x298   :  { %3085 = vmatpush1.bf16.msra.mxu1 %v3705_v29  ;;  %v3638_v29 = vcombine.high %v1862_v7, %v1866_v10 }
 0x299   :  { %3199 = vmatprep.subr.bf16.mxu1 %v3526_v12  ;;  %v1870_v12 = vld [vmem:[#allocation7 + $0x3d8] sm:$0xff] }
 0x29a   :  { %v3645_v18 = vcombine.low %v1870_v12, %v1874_v15 }
 0x29b   :  { %3103 = vmatmul.mubr.bf16.vlgmr.msra.gmra.mrb[16].mxu1 %v4376_v32 }
 0x29c   :  { %3200 = vmatpush1.bf16.msra.mxu1 %v3525_v14  ;;  %3231 = vmatprep.mubr.bf16.mxu1 %v4358_v9  ;;  %v3566_v9 = vcombine.high %v1790_v27, %v1794_v28  ;;  %v3646_v14 = vcombine.high %v1870_v12, %v1874_v15  ;;  %v1906_v27 = vld [vmem:[#allocation7 + $0x4f8] sm:$0xff] }
 0x29d   :  { %3201 = vmatprep.subr.bf16.mxu1 %v3534_v16  ;;  %v1878_v16 = vld [vmem:[#allocation7 + $0x418] sm:$0xff] }
 0x29e   :  { %v3653_v22 = vcombine.low %v1878_v16, %v1882_v17 }
 0x2a0   :  { %3202 = vmatpush1.bf16.msra.mxu1 %v3533_v19  ;;  %v3654_v19 = vcombine.high %v1878_v16, %v1882_v17 }
 0x2a1   :  { %3203 = vmatprep.subr.bf16.mxu1 %v3542_v20  ;;  %v1886_v20 = vld [vmem:[#allocation7 + $0x458] sm:$0xff] }
 0x2a2   :  { %v3661_v24 = vcombine.low %v1886_v20, %v1890_v21 }
 0x2a4   :  { %3204 = vmatpush1.bf16.msra.mxu1 %v3541_v23  ;;  %v3662_v23 = vcombine.high %v1886_v20, %v1890_v21  ;;  %v1967_v21 = vsub.s32 6, %v4341_v50 }
 0x2a5   :  { %3205 = vmatprep.subr.bf16.mxu1 %v3550_v53  ;;  %v1894_v53 = vld [vmem:[#allocation7 + $0x498] sm:$0xff] }
 0x2a6   :  { %v3669_v28 = vcombine.low %v1894_v53, %v1898_v56 }
 0x2a8   :  { %3206 = vmatpush1.bf16.msra.mxu1 %v3549_v25  ;;  %v3670_v25 = vcombine.high %v1894_v53, %v1898_v56 }
 0x2a9   :  { %3207 = vmatprep.subr.bf16.mxu1 %v3558_v26  ;;  %v1902_v26 = vld [vmem:[#allocation7 + $0x4d8] sm:$0xff] }
 0x2aa   :  { %v3677_v33 = vcombine.low %v1902_v26, %v1906_v27 }
 0x2ac   :  { %3208 = vmatpush1.bf16.msra.mxu1 %v3557_v30  ;;  %v3678_v30 = vcombine.high %v1902_v26, %v1906_v27 }
 0x2ad   :  { %3209 = vmatprep.subr.bf16.mxu1 %v3566_v9  ;;  %v1910_v9 = vld [vmem:[#allocation7 + $0x518] sm:$0xff] }
 0x2ae   :  { %v3685_v31 = vcombine.low %v1910_v9, %v1914_v51 }
 0x2b0   :  { %3210 = vmatpush1.bf16.msra.mxu1 %v3565_v35  ;;  %v3686_v35 = vcombine.high %v1910_v9, %v1914_v51 }
 0x2b1   :  { %3211 = vmatprep.subr.bf16.mxu1 %v3574_v59  ;;  %v1918_v59 = vld [vmem:[#allocation7 + $0x558] sm:$0xff] }
 0x2b4   :  { %3212 = vmatpush1.bf16.msra.mxu1 %v3573_v45  ;;  %v1930_v45 = vld [vmem:[#allocation7 + $0x5b8] sm:$0xff] }
 0x2b5   :  { %3213 = vmatprep.subr.bf16.mxu1 %v3582_v48  ;;  %v3702_v39 = vcombine.high %v1926_v34, %v1930_v45 }
 0x2b8   :  { %3214 = vmatpush1.bf16.msra.mxu1 %v3581_v37  ;;  %v1938_v37 = vld [vmem:[#allocation7 + $0x5f8] sm:$0xff] }
 0x2b9   :  { %3215 = vmatprep.subr.bf16.mxu1 %v3590_v38  ;;  %v3701_v38 = vcombine.low %v1926_v34, %v1930_v45  ;;  %v3710_v40 = vcombine.high %v1934_v36, %v1938_v37  ;;  %v3709_v41 = vcombine.low %v1934_v36, %v1938_v37 }
 0x2bc   :  { %3216 = vmatpush1.bf16.msra.mxu1 %v3589_v42  ;;  %v1959_v42 = vsub.s32 4, %v4341_v50 }
 0x2bd   :  { %3217 = vmatprep.subr.bf16.mxu1 %v3598_v43  ;;  %v1939_v43 = vld [vmem:[%s4418_s4] sm:$0xff]  ;;  %s4216_s4 = smov [#allocation8]  }
 0x2be   :  { %v1944_v46 = vrot.slane %v1939_v43, %v331_v52  ;;  %v1964_v57 = vrot.slane %v1939_v43, %v1963_v44  ;;  %s3306_s8 = sshll.u32 %s4216_s4, 4  ;;  %s3307_s8 = int_to_ptr.vmem [resolvable:$true] %s3306_s8 }
 0x2bf   :  { %s4180_s9 = scalar_lea.vmem %s3307_s8, 2048  ;;  %p4185_p11 = scmp.lt.s32.totalorder %s3307_s8, %s3307_s8 }
 0x2c0   :  { %3218 = vmatpush1.bf16.msra.mxu1 %v3597_v47  ;;  %v1960_v47 = vrot.slane %v1939_v43, %v1959_v42  ;;  %p4181_p10 = scmp.ne.s32.totalorder %s3307_s8, %s4180_s9  ;;  %p4186_p12 = scmp.lt.s32.totalorder %s4180_s9, %s4180_s9 }
 0x2c1   :  { %3219 = vmatprep.subr.bf16.mxu1 %v3606_v49  ;;  %v1948_v49 = vrot.slane %v1939_v43, %v335_v55 }
 0x2c2   :  { %p4187_p13 = por %p4186_p12, %p4185_p11 }
 0x2c4   :  { %3220 = vmatpush1.bf16.msra.mxu1 %v3605_v60  ;;  %p4188_p0 = pnand %p4187_p13, %p4181_p10 }
 0x2c5   :  { %3221 = vmatprep.subr.bf16.mxu1 %v3614_v61 }
 0x2c8   :  { %3222 = vmatpush1.bf16.msra.mxu1 %v3613_v1 }
 0x2c9   :  { %3223 = vmatprep.subr.bf16.mxu1 %v3622_v2 }
 0x2cc   :  { %3224 = vmatpush1.bf16.msra.mxu1 %v3621_v5 }
 0x2cd   :  { %3225 = vmatprep.subr.bf16.mxu1 %v3630_v6 }
 0x2d0   :  { %3226 = vmatpush1.bf16.msra.mxu1 %v3629_v11  ;;  %v1955_v11 = vsub.s32 3, %v4341_v50 }
 0x2d1   :  { %3227 = vmatprep.subr.bf16.mxu1 %v3638_v29  ;;  %v1952_v29 = vrot.slane %v1939_v43, %v339_v0 }
 0x2d2   :  { %v1956_v12 = vrot.slane %v1939_v43, %v1955_v11 }
 0x2d4   :  { %3228 = vmatpush1.bf16.msra.mxu1 %v3637_v13 }
 0x2d5   :  { %3229 = vmatprep.subr.bf16.mxu1 %v3646_v14 }
 0x2d8   :  { %3230 = vmatpush1.bf16.msra.mxu1 %v3645_v18 }
 0x2d9   :  { %3242 = vmatprep.subr.bf16.mxu1 %v3654_v19 }
 0x2db   :  { %3232 = vmatmul.mubr.bf16.vlgmr.msra.gmra.mrb[20].mxu1 %v4356_v8  ;;  %v1922_v8 = vld [vmem:[#allocation7 + $0x578] sm:$0xff] }
 0x2dc   :  { %3243 = vmatpush1.bf16.msra.mxu1 %v3653_v22  ;;  %3274 = vmatprep.mubr.bf16.mxu1 %v4215_v54  ;;  %v3694_v54 = vcombine.high %v1918_v59, %v1922_v8  ;;  %v3693_v48 = vcombine.low %v1918_v59, %v1922_v8  ;;  %v1971_v22 = vsub.s32 7, %v4341_v50 }
 0x2dd   :  { %3244 = vmatprep.subr.bf16.mxu1 %v3662_v23  ;;  %v1968_v23 = vrot.slane %v1939_v43, %v1967_v21 }
 0x2de   :  { %v1972_v53 = vrot.slane %v1939_v43, %v1971_v22 }
 0x2e0   :  { %3245 = vmatpush1.bf16.msra.mxu1 %v3661_v24 }
 0x2e1   :  { %3246 = vmatprep.subr.bf16.mxu1 %v3670_v25 }
 0x2e4   :  { %3247 = vmatpush1.bf16.msra.mxu1 %v3669_v28 }
 0x2e5   :  { %3248 = vmatprep.subr.bf16.mxu1 %v3678_v30 }
 0x2e8   :  { %3249 = vmatpush1.bf16.msra.mxu1 %v3677_v33 }
 0x2e9   :  { %3250 = vmatprep.subr.bf16.mxu1 %v3686_v35 }
 0x2ec   :  { %3251 = vmatpush1.bf16.msra.mxu1 %v3685_v31 }
 0x2ed   :  { %3252 = vmatprep.subr.bf16.mxu1 %v3694_v54 }
 0x2f0   :  { %3253 = vmatpush1.bf16.msra.mxu1 %v3693_v48 }
 0x2f1   :  { %3254 = vmatprep.subr.bf16.mxu1 %v3702_v39 }
 0x2f4   :  { %3255 = vmatpush1.bf16.msra.mxu1 %v3701_v38 }
 0x2f5   :  { %3256 = vmatprep.subr.bf16.mxu1 %v3710_v40 }
 0x2f8   :  { %3257 = vmatpush1.bf16.msra.mxu1 %v3709_v41 }
 0x2fb   :  { %3275 = vmatmul.mubr.bf16.vlgmr.msra.gmra.mrb[20].mxu1 %v4376_v32 }
 0x30e   :  { %v3018_v58 = vpop.f32.mrb[12].mxu1  ;;  %v3190_v60 = vpop.f32.mrb[8].mxu0 }
 0x30f   :  { %v3803_v61 = vadd.f32 %v3018_v58, %v1944_v46  ;;  %v3811_v32 = vadd.f32 %v3190_v60, %v1960_v47  ;;  %v3020_v62 = vpop.f32.mrb[13].mxu1  ;;  %v3192_v63 = vpop.f32.mrb[9].mxu0 }
 0x310   :  { %v3804_v1 = vadd.f32 %v3020_v62, %v1948_v49  ;;  %v3812_v2 = vadd.f32 %v3192_v63, %v1964_v57  ;;  %v3022_v3 = vpop.f32.mrb[14].mxu1  ;;  %v3194_v4 = vpop.f32.mrb[10].mxu0 }
 0x311   :  { %3285 = vst [vmem:[#allocation8] sm:$0xff] %v3803_v61  ;;  %3289 = vst [vmem:[#allocation8 + $0x20] sm:$0xff] %v3811_v32  ;;  %v3805_v5 = vadd.f32 %v3022_v3, %v1944_v46  ;;  %v3813_v6 = vadd.f32 %v3194_v4, %v1960_v47  ;;  %v3024_v52 = vpop.f32.mrb[15].mxu1  ;;  %v3196_v7 = vpop.f32.mrb[11].mxu0 }
 0x312   :  { %3286 = vst [vmem:[#allocation8 + $0x8] sm:$0xff] %v3804_v1  ;;  %3290 = vst [vmem:[#allocation8 + $0x28] sm:$0xff] %v3812_v2  ;;  %v3806_v55 = vadd.f32 %v3024_v52, %v1948_v49  ;;  %v3814_v10 = vadd.f32 %v3196_v7, %v1964_v57 }
 0x313   :  { %3293 = vst [vmem:[#allocation8 + $0x40] sm:$0xff] %v3805_v5  ;;  %3297 = vst [vmem:[#allocation8 + $0x60] sm:$0xff] %v3813_v6 }
 0x314   :  { %3294 = vst [vmem:[#allocation8 + $0x48] sm:$0xff] %v3806_v55  ;;  %3298 = vst [vmem:[#allocation8 + $0x68] sm:$0xff] %v3814_v10 }
 0x36e   :  { %v3104_v15 = vpop.f32.mrb[16].mxu1 }
 0x36f   :  { %v3807_v13 = vadd.f32 %v3104_v15, %v1952_v29  ;;  %v3106_v14 = vpop.f32.mrb[17].mxu1 }
 0x370   :  { %v3808_v16 = vadd.f32 %v3106_v14, %v1956_v12  ;;  %v3108_v17 = vpop.f32.mrb[18].mxu1 }
 0x371   :  { %3287 = vst [vmem:[#allocation8 + $0x10] sm:$0xff] %v3807_v13  ;;  %v3809_v18 = vadd.f32 %v3108_v17, %v1952_v29  ;;  %v3110_v19 = vpop.f32.mrb[19].mxu1 }
 0x372   :  { %3288 = vst [vmem:[#allocation8 + $0x18] sm:$0xff] %v3808_v16  ;;  %v3810_v20 = vadd.f32 %v3110_v19, %v1956_v12 }
 0x373   :  { %3295 = vst [vmem:[#allocation8 + $0x50] sm:$0xff] %v3809_v18 }
 0x374   :  { %3296 = vst [vmem:[#allocation8 + $0x58] sm:$0xff] %v3810_v20 }
 0x3ce   :  { %v3276_v0 = vpop.f32.mrb[20].mxu1 }
 0x3cf   :  { %v3815_v56 = vadd.f32 %v3276_v0, %v1968_v23  ;;  %v3278_v24 = vpop.f32.mrb[21].mxu1 }
 0x3d0   :  { %v3816_v25 = vadd.f32 %v3278_v24, %v1972_v53  ;;  %v3280_v26 = vpop.f32.mrb[22].mxu1 }
 0x3d1   :  { %3291 = vst [vmem:[#allocation8 + $0x30] sm:$0xff] %v3815_v56  ;;  %v3817_v27 = vadd.f32 %v3280_v26, %v1968_v23  ;;  %v3282_v28 = vpop.f32.mrb[23].mxu1 }
 0x3d2   :  { %3292 = vst [vmem:[#allocation8 + $0x38] sm:$0xff] %v3816_v25  ;;  %v3818_v30 = vadd.f32 %v3282_v28, %v1972_v53 }
 0x3d3   :  { %3299 = vst [vmem:[#allocation8 + $0x70] sm:$0xff] %v3817_v27 }
 0x3d4   :  { %3300 = vst [vmem:[#allocation8 + $0x78] sm:$0xff] %v3818_v30 }
 0x3d5   :  { %4191 = shalt.err (!%p4188_p0)
}
 0x3d6   :  { %s4192_s12 = scalar_lea.hbm %s4419_s5, 2048 }
 0x3d7   :  { %p4193_p1 = scmp.ne.s32.totalorder %s4419_s5, %s4192_s12  ;;  %p4196_p2 = scmp.lt.u32.totalorder %s4192_s12, %s4419_s5 }
 0x3d9   :  { %p4198_p3 = pnand %p4196_p2, %p4193_p1 }
 0x3db   :  { %4201 = shalt.err (!%p4198_p3)
}
 0x3dc   :  { %s4217_s1 = smov 1024   ;;  %s4218_s17 = smov 64  }
 0x3dd   :  { %3312 = dma.vmem_to_hbm [thread:$0]  %s3307_s8, 2048, %s4419_s5, [#allocation4], %s4217_s1, %s4217_s1, %s4218_s17  }
 0x3de   :  { %4206 = dma.done.wait [#allocation4], 2048  }
 0x3df   :  { %4207 = vsyncadd [#allocation4], 4294965248 }
 0x3e0   :  { %3316 = vsyncpa [#allocation3], 1 }
 0x3e1   :  { %3317 = vsyncpa [#allocation6], 1 }
 0x3e2   :  { %3318 = vsyncpa [#allocation4], 1 }

</bundles_post_ra>
